<compile_context>
chip_gen: v6e
topology: v6e:2x2x1
jax: 0.10.0
libtpu: 0.0.40
codegen_flags: <defaults>
</compile_context>

<pallas_src>
import functools

import jax
import jax.numpy as jnp
import numpy as np
from jax.experimental import pallas as pl
from jax.experimental.pallas import tpu as pltpu


# ---------------------------------------------------------------------------
# Fused kernel: backbone block + AdaptiveAvgPool2d((E, E)), B_blk images / step
# ---------------------------------------------------------------------------
def _fused_encoder_kernel(x_ref, w1_ref, b1_ref, w2_ref, b2_ref, w3_ref, b3_ref,
                          phb_ref, pwt_ref, o_ref):
    """Fused forward over one block of B_blk images, lane-dense [B_blk*H, W*C].

    1x1 convs are matmuls against kron(I_W, w) block-diagonal weights; the
    adaptive pool is (kron(I_B_blk, Ph) @ Y) @ kron(Pw, I_C)^T -> [B_blk*E, E*C].
    All matmul inputs are bf16, all accumulation is f32.
    """
    x = x_ref[...]                                                      # (M, W*C_in) bf16
    h = jnp.dot(x, w1_ref[...], preferred_element_type=jnp.float32) + b1_ref[...]
    h = jnp.maximum(h, 0.0)                                             # stem 1x1 conv + ReLU (f32)
    t = jnp.dot(h.astype(jnp.bfloat16), w2_ref[...],
                preferred_element_type=jnp.float32) + b2_ref[...]
    t = jnp.maximum(t, 0.0)                                             # bottleneck 1x1 conv + ReLU
    y = h + jnp.dot(t.astype(jnp.bfloat16), w3_ref[...],
                    preferred_element_type=jnp.float32) + b3_ref[...]
    y = jnp.maximum(y, 0.0).astype(jnp.bfloat16)                        # residual + ReLU (M, W*C)
    tmp = jnp.dot(phb_ref[...], y, preferred_element_type=jnp.float32)  # (B_blk*E, W*C) pool over H
    o_ref[...] = jnp.dot(tmp.astype(jnp.bfloat16), pwt_ref[...],
                         preferred_element_type=jnp.float32)            # (B_blk*E, E*C) pool over W


# ---------------------------------------------------------------------------
# Host-side (one-time) weight / pooling-matrix expansion
# ---------------------------------------------------------------------------
def adaptive_pool_matrix(in_size, out_size):
    """Row-stochastic averaging matrix matching torch AdaptiveAvgPool2d bins."""
    m = np.zeros((out_size, in_size), dtype=np.float32)
    for i in range(out_size):
        start = (i * in_size) // out_size
        end = -((-(i + 1) * in_size) // out_size)  # ceil((i+1)*in/out)
        m[i, start:end] = 1.0 / (end - start)
    return m


def choose_block_batch(batch, height, m_target=256, m_cap=2048):
    """Largest divisor of `batch` s.t. B_blk*H reaches ~m_target rows while
    keeping >= 2 grid steps (megacore / v7x dual-TC) and bounded VMEM."""
    max_blk = batch if batch < 2 else batch // 2
    best = 1
    for cand in range(1, max_blk + 1):
        if batch % cand != 0:
            continue
        if cand * height > m_cap:
            break
        best = cand
        if cand * height >= m_target:
            break
    return best


def prepare_encoder_params(params, *, height, width, encoded_image_size, block_batch):
    """One-time expansion to the lane-dense layout (cache per model, reuse per call)."""
    w, h, e = width, height, encoded_image_size
    w1 = np.asarray(params["w1"], np.float32)
    w2 = np.asarray(params["w2"], np.float32)
    w3 = np.asarray(params["w3"], np.float32)
    b1 = np.asarray(params["b1"], np.float32)
    b2 = np.asarray(params["b2"], np.float32)
    b3 = np.asarray(params["b3"], np.float32)
    c = w2.shape[0]

    eye_w = np.eye(w, dtype=np.float32)
    ph = adaptive_pool_matrix(h, e)                      # (E, H)
    pw = adaptive_pool_matrix(w, e)                      # (E, W)

    return {
        # kron-expanded 1x1-conv weights (bf16 MXU operands)
        "w1e": jnp.asarray(np.kron(eye_w, w1), jnp.bfloat16),   # (W*C_in, W*C)
        "w2e": jnp.asarray(np.kron(eye_w, w2), jnp.bfloat16),   # (W*C,    W*C)
        "w3e": jnp.asarray(np.kron(eye_w, w3), jnp.bfloat16),   # (W*C,    W*C)
        # biases added after f32 accumulation -> keep f32 (tiny)
        "b1e": jnp.asarray(np.tile(b1, (1, w)), jnp.float32),   # (1, W*C)
        "b2e": jnp.asarray(np.tile(b2, (1, w)), jnp.float32),
        "b3e": jnp.asarray(np.tile(b3, (1, w)), jnp.float32),
        # pooling matrices (bin weights 1/k are exact in bf16 for small bins)
        "phb": jnp.asarray(np.kron(np.eye(block_batch, dtype=np.float32), ph),
                           jnp.bfloat16),                        # (B_blk*E, B_blk*H)
        "pwt": jnp.asarray(np.kron(pw.T, np.eye(c, dtype=np.float32)),
                           jnp.bfloat16),                        # (W*C, E*C)
    }


# ---------------------------------------------------------------------------
# Wrapper: full EncoderAttention.forward
# ---------------------------------------------------------------------------
@functools.partial(jax.jit, static_argnames=("encoded_image_size", "block_batch"))
def encoder_attention_forward(images, expanded, encoded_image_size=14, block_batch=1):
    """images: NCHW [B, C_in, H, W] -> NHWC [B, E, E, C]."""
    b, c_in, h, w = images.shape
    e = encoded_image_size
    c = expanded["w2e"].shape[0] // w
    b_blk = block_batch
    n_steps = b // b_blk

    # NCHW -> [n_steps, B_blk*H, W*C_in] bf16, W*C_in folded on the lane axis.
    x = jnp.transpose(images, (0, 2, 3, 1)).astype(jnp.bfloat16)
    x = x.reshape(n_steps, b_blk * h, w * c_in)

    full = lambda arr: pl.BlockSpec(arr.shape, lambda i: (0,) * arr.ndim)

    out = pl.pallas_call(
        _fused_encoder_kernel,
        out_shape=jax.ShapeDtypeStruct((n_steps, b_blk * e, e * c), jnp.float32),
        grid=(n_steps,),
        in_specs=[
            pl.BlockSpec((None, b_blk * h, w * c_in), lambda i: (i, 0, 0)),
            full(expanded["w1e"]), full(expanded["b1e"]),
            full(expanded["w2e"]), full(expanded["b2e"]),
            full(expanded["w3e"]), full(expanded["b3e"]),
            full(expanded["phb"]), full(expanded["pwt"]),
        ],
        out_specs=pl.BlockSpec((None, b_blk * e, e * c), lambda i: (i, 0, 0)),
        compiler_params=pltpu.CompilerParams(dimension_semantics=("parallel",)),
    )(x, expanded["w1e"], expanded["b1e"], expanded["w2e"], expanded["b2e"],
      expanded["w3e"], expanded["b3e"], expanded["phb"], expanded["pwt"])

    # [n_steps, B_blk*E, E*C] -> [B, E, E, C] (matches outputs.permute(0,2,3,1)).
    return out.reshape(b, e, e, c)


# ---------------------------------------------------------------------------
# Synthetic backbone parameters + pure-JAX reference
# ---------------------------------------------------------------------------
def make_params(key, c_in=3, c=32):
    ks = jax.random.split(key, 6)
    s1 = 1.0 / np.sqrt(c_in)
    s2 = 1.0 / np.sqrt(c)
    return {
        "w1": jax.random.uniform(ks[0], (c_in, c), jnp.float32, -s1, s1),
        "b1": jax.random.uniform(ks[1], (1, c), jnp.float32, -s1, s1),
        "w2": jax.random.uniform(ks[2], (c, c), jnp.float32, -s2, s2),
        "b2": jax.random.uniform(ks[3], (1, c), jnp.float32, -s2, s2),
        "w3": jax.random.uniform(ks[4], (c, c), jnp.float32, -s2, s2),
        "b3": jax.random.uniform(ks[5], (1, c), jnp.float32, -s2, s2),
    }


def _reference_forward(images, params, encoded_image_size=14):
    """Pure-JAX f32 reference (unexpanded weights) for correctness checking."""
    b, c_in, h, w = images.shape
    x = jnp.transpose(images, (0, 2, 3, 1)).reshape(b * h * w, c_in)
    hdn = jnp.maximum(x @ params["w1"] + params["b1"], 0.0)
    t = jnp.maximum(hdn @ params["w2"] + params["b2"], 0.0)
    y = jnp.maximum(hdn + t @ params["w3"] + params["b3"], 0.0)
    c = y.shape[-1]
    feat = y.reshape(b, h, w, c).transpose(0, 3, 1, 2)
    ph = jnp.asarray(adaptive_pool_matrix(h, encoded_image_size))
    pw = jnp.asarray(adaptive_pool_matrix(w, encoded_image_size))
    pooled = jnp.einsum("ih,bchw,jw->bcij", ph, feat, pw)
    return jnp.transpose(pooled, (0, 2, 3, 1))


if __name__ == "__main__":
    key = jax.random.PRNGKey(0)
    k_img, k_par, k_img2 = jax.random.split(key, 3)

    C_IN, H, W, C, E = 3, 16, 16, 32, 14
    params = make_params(k_par, c_in=C_IN, c=C)

    # --- case 1: module-default small batch (B=2 -> B_blk=1, grid=(2,)) ---
    B = 2
    images = jax.random.normal(k_img, (B, C_IN, H, W), dtype=jnp.float32)
    b_blk = choose_block_batch(B, H)
    expanded = prepare_encoder_params(params, height=H, width=W,
                                      encoded_image_size=E, block_batch=b_blk)
    out = encoder_attention_forward(images, expanded, encoded_image_size=E,
                                    block_batch=b_blk)
    out = jax.block_until_ready(out)
    assert out.shape == (B, E, E, C), out.shape
    ref = _reference_forward(images, params, encoded_image_size=E)
    np.testing.assert_allclose(np.asarray(out), np.asarray(ref), rtol=2e-2, atol=2e-2)

    # --- case 2: batched-M path (B=8 -> B_blk=4, M=64 rows per step, grid=(2,)) ---
    B2 = 8
    images2 = jax.random.normal(k_img2, (B2, C_IN, H, W), dtype=jnp.float32)
    b_blk2 = choose_block_batch(B2, H)
    expanded2 = prepare_encoder_params(params, height=H, width=W,
                                       encoded_image_size=E, block_batch=b_blk2)
    out2 = encoder_attention_forward(images2, expanded2, encoded_image_size=E,
                                     block_batch=b_blk2)
    out2 = jax.block_until_ready(out2)
    assert out2.shape == (B2, E, E, C), out2.shape
    ref2 = _reference_forward(images2, params, encoded_image_size=E)
    np.testing.assert_allclose(np.asarray(out2), np.asarray(ref2), rtol=2e-2, atol=2e-2)

    print("KERNEL_OK")
</pallas_src>

<mosaic_0001>
module attributes {stable_mosaic.version = 11 : i64} {
  func.func @_fused_encoder_kernel(%arg0: i32, %arg1: memref<1x16x48xbf16, #tpu.memory_space<vmem>>, %arg2: memref<48x512xbf16, #tpu.memory_space<vmem>>, %arg3: memref<1x512xf32, #tpu.memory_space<vmem>>, %arg4: memref<512x512xbf16, #tpu.memory_space<vmem>>, %arg5: memref<1x512xf32, #tpu.memory_space<vmem>>, %arg6: memref<512x512xbf16, #tpu.memory_space<vmem>>, %arg7: memref<1x512xf32, #tpu.memory_space<vmem>>, %arg8: memref<14x16xbf16, #tpu.memory_space<vmem>>, %arg9: memref<512x448xbf16, #tpu.memory_space<vmem>>, %arg10: memref<1x14x448xf32, #tpu.memory_space<vmem>>) attributes {dimension_semantics = [#tpu.dimension_semantics<parallel>], iteration_bounds = array<i64: 2>, scalar_prefetch = 0 : i64, scratch_operands = 0 : i64, tpu.core_type = #tpu.core_type<tc>, window_params = [{transform_indices = @transform_0, window_bounds = array<i64: 1, 16, 48>}, {pipeline_mode = #tpu.pipeline_mode<synchronous>, transform_indices = @transform_1, window_bounds = array<i64: 48, 512>}, {pipeline_mode = #tpu.pipeline_mode<synchronous>, transform_indices = @transform_2, window_bounds = array<i64: 1, 512>}, {pipeline_mode = #tpu.pipeline_mode<synchronous>, transform_indices = @transform_3, window_bounds = array<i64: 512, 512>}, {pipeline_mode = #tpu.pipeline_mode<synchronous>, transform_indices = @transform_4, window_bounds = array<i64: 1, 512>}, {pipeline_mode = #tpu.pipeline_mode<synchronous>, transform_indices = @transform_5, window_bounds = array<i64: 512, 512>}, {pipeline_mode = #tpu.pipeline_mode<synchronous>, transform_indices = @transform_6, window_bounds = array<i64: 1, 512>}, {pipeline_mode = #tpu.pipeline_mode<synchronous>, transform_indices = @transform_7, window_bounds = array<i64: 14, 16>}, {pipeline_mode = #tpu.pipeline_mode<synchronous>, transform_indices = @transform_8, window_bounds = array<i64: 512, 448>}, {transform_indices = @transform_9, window_bounds = array<i64: 1, 14, 448>}]} {
    %c0 = arith.constant 0 : index
    %c0_0 = arith.constant 0 : index
    %c0_1 = arith.constant 0 : index
    %0 = vector.load %arg1[%c0, %c0_0, %c0_1] : memref<1x16x48xbf16, #tpu.memory_space<vmem>>, vector<1x16x48xbf16>
    %1 = vector.shape_cast %0 : vector<1x16x48xbf16> to vector<16x48xbf16>
    %c0_2 = arith.constant 0 : index
    %c0_3 = arith.constant 0 : index
    %2 = vector.load %arg2[%c0_2, %c0_3] : memref<48x512xbf16, #tpu.memory_space<vmem>>, vector<48x512xbf16>
    %cst = arith.constant dense<0.000000e+00> : vector<16x512xf32>
    %3 = tpu.matmul %1, %2, %cst {dimension_numbers = #tpu.dot_dimension_numbers<[1], [0], [0], [1], [0, 0, 1, 1], [], []>} : vector<16x48xbf16>, vector<48x512xbf16>, vector<16x512xf32> -> vector<16x512xf32>
    %c0_4 = arith.constant 0 : index
    %c0_5 = arith.constant 0 : index
    %4 = vector.load %arg3[%c0_4, %c0_5] : memref<1x512xf32, #tpu.memory_space<vmem>>, vector<1x512xf32>
    %5 = vector.broadcast %4 : vector<1x512xf32> to vector<16x512xf32>
    %6 = arith.addf %3, %5 : vector<16x512xf32>
    %cst_6 = arith.constant 0.000000e+00 : f32
    %7 = vector.broadcast %cst_6 : f32 to vector<16x512xf32>
    %8 = arith.maximumf %6, %7 : vector<16x512xf32>
    %9 = arith.truncf %8 : vector<16x512xf32> to vector<16x512xbf16>
    %c0_7 = arith.constant 0 : index
    %c0_8 = arith.constant 0 : index
    %10 = vector.load %arg4[%c0_7, %c0_8] : memref<512x512xbf16, #tpu.memory_space<vmem>>, vector<512x512xbf16>
    %cst_9 = arith.constant dense<0.000000e+00> : vector<16x512xf32>
    %11 = tpu.matmul %9, %10, %cst_9 {dimension_numbers = #tpu.dot_dimension_numbers<[1], [0], [0], [1], [0, 0, 1, 1], [], []>} : vector<16x512xbf16>, vector<512x512xbf16>, vector<16x512xf32> -> vector<16x512xf32>
    %c0_10 = arith.constant 0 : index
    %c0_11 = arith.constant 0 : index
    %12 = vector.load %arg5[%c0_10, %c0_11] : memref<1x512xf32, #tpu.memory_space<vmem>>, vector<1x512xf32>
    %13 = vector.broadcast %12 : vector<1x512xf32> to vector<16x512xf32>
    %14 = arith.addf %11, %13 : vector<16x512xf32>
    %cst_12 = arith.constant 0.000000e+00 : f32
    %15 = vector.broadcast %cst_12 : f32 to vector<16x512xf32>
    %16 = arith.maximumf %14, %15 : vector<16x512xf32>
    %17 = arith.truncf %16 : vector<16x512xf32> to vector<16x512xbf16>
    %c0_13 = arith.constant 0 : index
    %c0_14 = arith.constant 0 : index
    %18 = vector.load %arg6[%c0_13, %c0_14] : memref<512x512xbf16, #tpu.memory_space<vmem>>, vector<512x512xbf16>
    %cst_15 = arith.constant dense<0.000000e+00> : vector<16x512xf32>
    %19 = tpu.matmul %17, %18, %cst_15 {dimension_numbers = #tpu.dot_dimension_numbers<[1], [0], [0], [1], [0, 0, 1, 1], [], []>} : vector<16x512xbf16>, vector<512x512xbf16>, vector<16x512xf32> -> vector<16x512xf32>
    %20 = arith.addf %8, %19 : vector<16x512xf32>
    %c0_16 = arith.constant 0 : index
    %c0_17 = arith.constant 0 : index
    %21 = vector.load %arg7[%c0_16, %c0_17] : memref<1x512xf32, #tpu.memory_space<vmem>>, vector<1x512xf32>
    %22 = vector.broadcast %21 : vector<1x512xf32> to vector<16x512xf32>
    %23 = arith.addf %20, %22 : vector<16x512xf32>
    %cst_18 = arith.constant 0.000000e+00 : f32
    %24 = vector.broadcast %cst_18 : f32 to vector<16x512xf32>
    %25 = arith.maximumf %23, %24 : vector<16x512xf32>
    %26 = arith.truncf %25 : vector<16x512xf32> to vector<16x512xbf16>
    %c0_19 = arith.constant 0 : index
    %c0_20 = arith.constant 0 : index
    %27 = vector.load %arg8[%c0_19, %c0_20] : memref<14x16xbf16, #tpu.memory_space<vmem>>, vector<14x16xbf16>
    %cst_21 = arith.constant dense<0.000000e+00> : vector<14x512xf32>
    %28 = tpu.matmul %27, %26, %cst_21 {dimension_numbers = #tpu.dot_dimension_numbers<[1], [0], [0], [1], [0, 0, 1, 1], [], []>} : vector<14x16xbf16>, vector<16x512xbf16>, vector<14x512xf32> -> vector<14x512xf32>
    %29 = arith.truncf %28 : vector<14x512xf32> to vector<14x512xbf16>
    %c0_22 = arith.constant 0 : index
    %c0_23 = arith.constant 0 : index
    %30 = vector.load %arg9[%c0_22, %c0_23] : memref<512x448xbf16, #tpu.memory_space<vmem>>, vector<512x448xbf16>
    %cst_24 = arith.constant dense<0.000000e+00> : vector<14x448xf32>
    %31 = tpu.matmul %29, %30, %cst_24 {dimension_numbers = #tpu.dot_dimension_numbers<[1], [0], [0], [1], [0, 0, 1, 1], [], []>} : vector<14x512xbf16>, vector<512x448xbf16>, vector<14x448xf32> -> vector<14x448xf32>
    %c0_25 = arith.constant 0 : index
    %c0_26 = arith.constant 0 : index
    %c0_27 = arith.constant 0 : index
    %32 = vector.load %arg10[%c0_25, %c0_26, %c0_27] : memref<1x14x448xf32, #tpu.memory_space<vmem>>, vector<1x14x448xf32>
    %33 = vector.shape_cast %32 : vector<1x14x448xf32> to vector<14x448xf32>
    %34 = vector.shape_cast %31 : vector<14x448xf32> to vector<1x14x448xf32>
    tpu.vector_store %arg10[%c0_25, %c0_26, %c0_27], %34 {strides = array<i32>} : memref<1x14x448xf32, #tpu.memory_space<vmem>>, vector<1x14x448xf32>,
    return
  }
  func.func @transform_0(%arg0: i32) -> (i32, i32, i32) {
    %c0_i32 = arith.constant 0 : i32
    %c0_i32_0 = arith.constant 0 : i32
    %c0_i32_1 = arith.constant 0 : i32
    return %arg0, %c0_i32, %c0_i32_0 : i32, i32, i32
  }
  func.func @transform_1(%arg0: i32) -> (i32, i32) {
    %c0_i32 = arith.constant 0 : i32
    %c0_i32_0 = arith.constant 0 : i32
    %c0_i32_1 = arith.constant 0 : i32
    return %c0_i32, %c0_i32_0 : i32, i32
  }
  func.func @transform_2(%arg0: i32) -> (i32, i32) {
    %c0_i32 = arith.constant 0 : i32
    %c0_i32_0 = arith.constant 0 : i32
    %c0_i32_1 = arith.constant 0 : i32
    return %c0_i32, %c0_i32_0 : i32, i32
  }
  func.func @transform_3(%arg0: i32) -> (i32, i32) {
    %c0_i32 = arith.constant 0 : i32
    %c0_i32_0 = arith.constant 0 : i32
    %c0_i32_1 = arith.constant 0 : i32
    return %c0_i32, %c0_i32_0 : i32, i32
  }
  func.func @transform_4(%arg0: i32) -> (i32, i32) {
    %c0_i32 = arith.constant 0 : i32
    %c0_i32_0 = arith.constant 0 : i32
    %c0_i32_1 = arith.constant 0 : i32
    return %c0_i32, %c0_i32_0 : i32, i32
  }
  func.func @transform_5(%arg0: i32) -> (i32, i32) {
    %c0_i32 = arith.constant 0 : i32
    %c0_i32_0 = arith.constant 0 : i32
    %c0_i32_1 = arith.constant 0 : i32
    return %c0_i32, %c0_i32_0 : i32, i32
  }
  func.func @transform_6(%arg0: i32) -> (i32, i32) {
    %c0_i32 = arith.constant 0 : i32
    %c0_i32_0 = arith.constant 0 : i32
    %c0_i32_1 = arith.constant 0 : i32
    return %c0_i32, %c0_i32_0 : i32, i32
  }
  func.func @transform_7(%arg0: i32) -> (i32, i32) {
    %c0_i32 = arith.constant 0 : i32
    %c0_i32_0 = arith.constant 0 : i32
    %c0_i32_1 = arith.constant 0 : i32
    return %c0_i32, %c0_i32_0 : i32, i32
  }
  func.func @transform_8(%arg0: i32) -> (i32, i32) {
    %c0_i32 = arith.constant 0 : i32
    %c0_i32_0 = arith.constant 0 : i32
    %c0_i32_1 = arith.constant 0 : i32
    return %c0_i32, %c0_i32_0 : i32, i32
  }
  func.func @transform_9(%arg0: i32) -> (i32, i32, i32) {
    %c0_i32 = arith.constant 0 : i32
    %c0_i32_0 = arith.constant 0 : i32
    %c0_i32_1 = arith.constant 0 : i32
    return %arg0, %c0_i32, %c0_i32_0 : i32, i32, i32
  }
}

</mosaic_0001>

<bundles_post_ra>
// kernel: encoder_attention_forward.1
= control target key start
LH: loop header
LB: loop body
LE: loop exit
PB: predicated region body
PF: predicated region fallthrough
CT: control target
= control target key end

     0   :  { %s4686_s30 = smov 0   ;;  %s6039_s0 = inlined_call_operand.vmem [shape: bf16[2,16,48], index: 0, kind: input, shape index: {}]   ;;  %s6040_s1 = inlined_call_operand.vmem [shape: bf16[48,512], index: 1, kind: input, shape index: {}]   ;;  %s6041_s2 = inlined_call_operand.vmem [shape: f32[1,512], index: 2, kind: input, shape index: {}]   ;;  %s6042_s3 = inlined_call_operand.vmem [shape: bf16[512,512], index: 3, kind: input, shape index: {}]   ;;  %s6043_s4 = inlined_call_operand.vmem [shape: f32[1,512], index: 4, kind: input, shape index: {}]   ;;  %s6044_s5 = inlined_call_operand.vmem [shape: bf16[512,512], index: 5, kind: input, shape index: {}]   ;;  %s6045_s6 = inlined_call_operand.vmem [shape: f32[1,512], index: 6, kind: input, shape index: {}]   ;;  %s6046_s7 = inlined_call_operand.vmem [shape: bf16[14,16], index: 7, kind: input, shape index: {}]   ;;  %s6047_s8 = inlined_call_operand.vmem [shape: bf16[512,448], index: 8, kind: input, shape index: {}]   ;;  %s6048_s9 = inlined_call_operand.vmem [shape: f32[2,14,448], index: 9, kind: output, shape index: {}]  }
   0x1 LB: > { %s3607_s10 = sadd.s32 4294967295, %s4633_s30   ;;  %p3611_p0 = scmp.ge.s32.totalorder %s4633_s30, 1  ;;  %s4633_s30 = sphi %s4686_s30, %s19_s30  }
   0x2   : > { %p287_p1 = scmp.lt.s32.totalorder %s4633_s30, 3 }
   0x4   : > { %p288_p2 = pnand %p3611_p0, %p287_p1 }
   0x5   : > { %p323_p3 = scmp.lt.s32.totalorder (!%p288_p2), %s3607_s10, 1 }
   0x6   : > { %291 = sbr.rel (%p288_p2) target bundleno = 1248 (0x4e0), region = 56 }
   0xb   : > { %v4031_v0 = vld [vmem:[%s6040_s1 + $0x44] ss:$16 sps:$4 sm:$0xff]   ;;  %v4033_v1 = vld [vmem:[%s6040_s1 + $0x4c] ss:$16 sps:$4 sm:$0xff]   ;;  %v4635_v2 = vmov 0   ;;  %s6050_s10 = smov (!%p323_p3, %s3607_s10), 1 }
   0xc   : > { %471 = vmatprep.mubr.bf16.mxu0 %v4635_v2  ;;  %514 = vmatprep.mubr.bf16.mxu1 %v4635_v2  ;;  %v4035_v3 = vld [vmem:[%s6040_s1 + $0x40] ss:$16 sps:$4 sm:$0xff]   ;;  %v4036_v4 = vld [vmem:[%s6040_s1 + $0x48] ss:$16 sps:$4 sm:$0xff]   ;;  %v4037_v5 = vld [vmem:[%s6040_s1 + $0x24] ss:$16 sps:$4 sm:$0xff]  }
   0xd   : > { %449 = vmatprep.subr.bf16.mxu0 %v4031_v0  ;;  %492 = vmatprep.subr.bf16.mxu1 %v4033_v1  ;;  %v4039_v6 = vld [vmem:[%s6040_s1 + $0x2c] ss:$16 sps:$4 sm:$0xff]   ;;  %v4041_v7 = vld [vmem:[%s6040_s1 + $0x20] ss:$16 sps:$4 sm:$0xff]   ;;  %s4020_s25 = sshll.u32 %s6050_s10, 3  ;;  %vm435_vm0 = vcmask 392192  }
   0xe   : > { %450 = vmatpush1.bf16.msra.mxu0 %v4035_v3  ;;  %493 = vmatpush1.bf16.msra.mxu1 %v4036_v4  ;;  %v4042_v8 = vld [vmem:[%s6040_s1 + $0x28] ss:$16 sps:$4 sm:$0xff]   ;;  %v4043_v9 = vld [vmem:[%s6040_s1 + $0x4] ss:$16 sps:$4 sm:$0xff]   ;;  %v4045_v10 = vld [vmem:[%s6040_s1 + $0xc] ss:$16 sps:$4 sm:$0xff]   ;;  %s327_s17 = scalar_lea.vmem %s6039_s0, %s4020_s25 }
   0xf   : > { %451 = vmatprep.subr.bf16.mxu0 %v4037_v5  ;;  %494 = vmatprep.subr.bf16.mxu1 %v4039_v6  ;;  %v4047_v11 = vld [vmem:[%s6040_s1] ss:$16 sps:$4 sm:$0xff]   ;;  %v4048_v12 = vld [vmem:[%s6040_s1 + $0x8] ss:$16 sps:$4 sm:$0xff]   ;;  %v4052_v13 = vld [vmem:[%s6042_s3 + $0xe4] ss:$16 sps:$4 sm:$0xff]  }
  0x10   : > { %v4049_v14 = vld [vmem:[%s327_s17] sm:$0xff]   ;;  %vm2508_vm1 = vcmask 130048   ;;  %s4021_s17 = sshll.u32 %s6050_s10, 6  ;;  %vm3545_vm2 = vcmask 523264   ;;  %vm3550_vm3 = vcmask 521216  }
  0x11   : > { %v4055_v15 = vld [vmem:[%s6042_s3 + $0x2e4] ss:$16 sps:$4 sm:$0xff]   ;;  %v4050_v16 = vld [vmem:[%s6042_s3 + $0xe0] ss:$16 sps:$4 sm:$0xff]   ;;  %s6026_s20 = scalar_lea.vmem %s6048_s9, %s4021_s17 }
  0x12   : > { %452 = vmatpush1.bf16.msra.mxu0 %v4041_v7  ;;  %495 = vmatpush1.bf16.msra.mxu1 %v4042_v8  ;;  %v4053_v17 = vld [vmem:[%s6042_s3 + $0x2e0] ss:$16 sps:$4 sm:$0xff]   ;;  %v4058_v18 = vld [vmem:[%s6042_s3 + $0xc4] ss:$16 sps:$4 sm:$0xff]  }
  0x13   : > { %453 = vmatprep.subr.bf16.mxu0 %v4043_v9  ;;  %496 = vmatprep.subr.bf16.mxu1 %v4045_v10  ;;  %v4061_v19 = vld [vmem:[%s6042_s3 + $0x2c4] ss:$16 sps:$4 sm:$0xff]   ;;  %v4056_v20 = vld [vmem:[%s6042_s3 + $0xc0] ss:$16 sps:$4 sm:$0xff]  }
  0x14   : > { %v4059_v21 = vld [vmem:[%s6042_s3 + $0x2c0] ss:$16 sps:$4 sm:$0xff]   ;;  %v4064_v22 = vld [vmem:[%s6042_s3 + $0xa4] ss:$16 sps:$4 sm:$0xff]  }
  0x15   : > { %v4067_v23 = vld [vmem:[%s6042_s3 + $0x2a4] ss:$16 sps:$4 sm:$0xff]   ;;  %v4062_v24 = vld [vmem:[%s6042_s3 + $0xa0] ss:$16 sps:$4 sm:$0xff]  }
  0x16   : > { %454 = vmatpush1.bf16.msra.mxu0 %v4047_v11  ;;  %497 = vmatpush1.bf16.msra.mxu1 %v4048_v12  ;;  %v4065_v25 = vld [vmem:[%s6042_s3 + $0x2a0] ss:$16 sps:$4 sm:$0xff]   ;;  %v4070_v26 = vld [vmem:[%s6042_s3 + $0x84] ss:$16 sps:$4 sm:$0xff]  }
  0x17   : > { %1327 = vmatprep.subr.bf16.mxu0 %v4052_v13  ;;  %1370 = vmatprep.subr.bf16.mxu1 %v4055_v15  ;;  %v4073_v27 = vld [vmem:[%s6042_s3 + $0x284] ss:$16 sps:$4 sm:$0xff]   ;;  %v4068_v28 = vld [vmem:[%s6042_s3 + $0x80] ss:$16 sps:$4 sm:$0xff]   ;;  %v4148_v15 = vld [vmem:[%s6042_s3 + $0xec] ss:$16 sps:$4 sm:$0xff]  }
  0x18   : > { %v4071_v29 = vld [vmem:[%s6042_s3 + $0x280] ss:$16 sps:$4 sm:$0xff]   ;;  %v4076_v30 = vld [vmem:[%s6042_s3 + $0x64] ss:$16 sps:$4 sm:$0xff]  }
  0x19   : > { %3629 = vmatmul.mubr.msk.bf16.vlgmr.msra.gmra.mxu0 %vm435_vm0, %v4049_v14  ;;  %3630 = vmatmul.mubr.msk.bf16.vlgmr.msra.gmra.mxu1 %vm435_vm0, %v4049_v14  ;;  %v4079_v31 = vld [vmem:[%s6042_s3 + $0x264] ss:$16 sps:$4 sm:$0xff]   ;;  %v4074_v32 = vld [vmem:[%s6042_s3 + $0x60] ss:$16 sps:$4 sm:$0xff]  }
  0x1a   : > { %1328 = vmatpush1.bf16.msra.mxu0 %v4050_v16  ;;  %1371 = vmatpush1.bf16.msra.mxu1 %v4053_v17  ;;  %v4077_v33 = vld [vmem:[%s6042_s3 + $0x260] ss:$16 sps:$4 sm:$0xff]   ;;  %v4082_v34 = vld [vmem:[%s6042_s3 + $0x44] ss:$16 sps:$4 sm:$0xff]   ;;  %v4151_v16 = vld [vmem:[%s6042_s3 + $0x2ec] ss:$16 sps:$4 sm:$0xff]   ;;  %v350_v17 = vlaneseq }
  0x1b   : > { %1329 = vmatprep.subr.bf16.mxu0 %v4058_v18  ;;  %1372 = vmatprep.subr.bf16.mxu1 %v4061_v19  ;;  %v4085_v35 = vld [vmem:[%s6042_s3 + $0x244] ss:$16 sps:$4 sm:$0xff]   ;;  %v4080_v36 = vld [vmem:[%s6042_s3 + $0x40] ss:$16 sps:$4 sm:$0xff]  }
  0x1c   : > { %v4083_v37 = vld [vmem:[%s6042_s3 + $0x240] ss:$16 sps:$4 sm:$0xff]   ;;  %v4088_v38 = vld [vmem:[%s6042_s3 + $0x24] ss:$16 sps:$4 sm:$0xff]   ;;  %v351_v18 = vshrl.u32 %v350_v17, 7 }
  0x1d   : > { %v4091_v39 = vld [vmem:[%s6042_s3 + $0x224] ss:$16 sps:$4 sm:$0xff]   ;;  %v4086_v40 = vld [vmem:[%s6042_s3 + $0x20] ss:$16 sps:$4 sm:$0xff]   ;;  %v4182_v17 = vld [vmem:[%s6042_s3 + $0x28] ss:$16 sps:$4 sm:$0xff]  }
  0x1e   : > { %1330 = vmatpush1.bf16.msra.mxu0 %v4056_v20  ;;  %1373 = vmatpush1.bf16.msra.mxu1 %v4059_v21  ;;  %v4089_v41 = vld [vmem:[%s6042_s3 + $0x220] ss:$16 sps:$4 sm:$0xff]   ;;  %v4094_v42 = vld [vmem:[%s6042_s3 + $0x4] ss:$16 sps:$4 sm:$0xff]   ;;  %v4936_v19 = vsub.s32 1, %v351_v18  ;;  %v4938_v20 = vsub.s32 3, %v351_v18 }
  0x1f   : > { %1331 = vmatprep.subr.bf16.mxu0 %v4064_v22  ;;  %1374 = vmatprep.subr.bf16.mxu1 %v4067_v23  ;;  %v4097_v43 = vld [vmem:[%s6042_s3 + $0x204] ss:$16 sps:$4 sm:$0xff]   ;;  %v4092_v44 = vld [vmem:[%s6042_s3] ss:$16 sps:$4 sm:$0xff]   ;;  %v4940_v21 = vsub.s32 0, %v351_v18  ;;  %v4942_v22 = vsub.s32 2, %v351_v18 }
  0x20   : > { %v4095_v45 = vld [vmem:[%s6042_s3 + $0x200] ss:$16 sps:$4 sm:$0xff]   ;;  %v4100_v46 = vld [vmem:[%s6042_s3 + $0x1e4] ss:$16 sps:$4 sm:$0xff]   ;;  %v4185_v18 = vld [vmem:[%s6042_s3 + $0x228] ss:$16 sps:$4 sm:$0xff]  }
  0x21   : > { %v4103_v47 = vld [vmem:[%s6042_s3 + $0x3e4] ss:$16 sps:$4 sm:$0xff]   ;;  %v4098_v48 = vld [vmem:[%s6042_s3 + $0x1e0] ss:$16 sps:$4 sm:$0xff]  }
  0x22   : > { %1332 = vmatpush1.bf16.msra.mxu0 %v4062_v24  ;;  %1375 = vmatpush1.bf16.msra.mxu1 %v4065_v25  ;;  %v4101_v49 = vld [vmem:[%s6042_s3 + $0x3e0] ss:$16 sps:$4 sm:$0xff]   ;;  %v4106_v50 = vld [vmem:[%s6042_s3 + $0x1c4] ss:$16 sps:$4 sm:$0xff]  }
  0x23   : > { %1333 = vmatprep.subr.bf16.mxu0 %v4070_v26  ;;  %1376 = vmatprep.subr.bf16.mxu1 %v4073_v27  ;;  %v4109_v51 = vld [vmem:[%s6042_s3 + $0x3c4] ss:$16 sps:$4 sm:$0xff]   ;;  %v4104_v52 = vld [vmem:[%s6042_s3 + $0x1c0] ss:$16 sps:$4 sm:$0xff]  }
  0x24   : > { %v4107_v53 = vld [vmem:[%s6042_s3 + $0x3c0] ss:$16 sps:$4 sm:$0xff]   ;;  %v4112_v54 = vld [vmem:[%s6042_s3 + $0x1a4] ss:$16 sps:$4 sm:$0xff]  }
  0x25   : > { %v4115_v55 = vld [vmem:[%s6042_s3 + $0x3a4] ss:$16 sps:$4 sm:$0xff]   ;;  %v4110_v56 = vld [vmem:[%s6042_s3 + $0x1a0] ss:$16 sps:$4 sm:$0xff]  }
  0x26   : > { %1334 = vmatpush1.bf16.msra.mxu0 %v4068_v28  ;;  %1377 = vmatpush1.bf16.msra.mxu1 %v4071_v29  ;;  %v4113_v57 = vld [vmem:[%s6042_s3 + $0x3a0] ss:$16 sps:$4 sm:$0xff]   ;;  %v4118_v58 = vld [vmem:[%s6042_s3 + $0x184] ss:$16 sps:$4 sm:$0xff]  }
  0x27   : > { %1335 = vmatprep.subr.bf16.mxu0 %v4076_v30  ;;  %1378 = vmatprep.subr.bf16.mxu1 %v4079_v31  ;;  %v4121_v59 = vld [vmem:[%s6042_s3 + $0x384] ss:$16 sps:$4 sm:$0xff]   ;;  %v4116_v60 = vld [vmem:[%s6042_s3 + $0x180] ss:$16 sps:$4 sm:$0xff]  }
  0x28   : > { %v4119_v61 = vld [vmem:[%s6042_s3 + $0x380] ss:$16 sps:$4 sm:$0xff]   ;;  %v4124_v62 = vld [vmem:[%s6042_s3 + $0x164] ss:$16 sps:$4 sm:$0xff]  }
  0x29   : > { %v4127_v63 = vld [vmem:[%s6042_s3 + $0x364] ss:$16 sps:$4 sm:$0xff]   ;;  %v4122_v0 = vld [vmem:[%s6042_s3 + $0x160] ss:$16 sps:$4 sm:$0xff]  }
  0x2a   : > { %1336 = vmatpush1.bf16.msra.mxu0 %v4074_v32  ;;  %1379 = vmatpush1.bf16.msra.mxu1 %v4077_v33  ;;  %v4125_v1 = vld [vmem:[%s6042_s3 + $0x360] ss:$16 sps:$4 sm:$0xff]   ;;  %v4130_v3 = vld [vmem:[%s6042_s3 + $0x144] ss:$16 sps:$4 sm:$0xff]  }
  0x2b   : > { %1337 = vmatprep.subr.bf16.mxu0 %v4082_v34  ;;  %1380 = vmatprep.subr.bf16.mxu1 %v4085_v35  ;;  %v4133_v4 = vld [vmem:[%s6042_s3 + $0x344] ss:$16 sps:$4 sm:$0xff]   ;;  %v4128_v5 = vld [vmem:[%s6042_s3 + $0x140] ss:$16 sps:$4 sm:$0xff]  }
  0x2c   : > { %v4131_v6 = vld [vmem:[%s6042_s3 + $0x340] ss:$16 sps:$4 sm:$0xff]   ;;  %v4136_v7 = vld [vmem:[%s6042_s3 + $0x124] ss:$16 sps:$4 sm:$0xff]  }
  0x2d   : > { %v4139_v8 = vld [vmem:[%s6042_s3 + $0x324] ss:$16 sps:$4 sm:$0xff]   ;;  %v4134_v9 = vld [vmem:[%s6042_s3 + $0x120] ss:$16 sps:$4 sm:$0xff]  }
  0x2e   : > { %1338 = vmatpush1.bf16.msra.mxu0 %v4080_v36  ;;  %1381 = vmatpush1.bf16.msra.mxu1 %v4083_v37  ;;  %v4137_v10 = vld [vmem:[%s6042_s3 + $0x320] ss:$16 sps:$4 sm:$0xff]   ;;  %v4142_v11 = vld [vmem:[%s6042_s3 + $0x104] ss:$16 sps:$4 sm:$0xff]  }
  0x2f   : > { %1339 = vmatprep.subr.bf16.mxu0 %v4088_v38  ;;  %1382 = vmatprep.subr.bf16.mxu1 %v4091_v39  ;;  %v4145_v12 = vld [vmem:[%s6042_s3 + $0x304] ss:$16 sps:$4 sm:$0xff]   ;;  %v4140_v13 = vld [vmem:[%s6042_s3 + $0x100] ss:$16 sps:$4 sm:$0xff]  }
  0x30   : > { %v4143_v14 = vld [vmem:[%s6042_s3 + $0x300] ss:$16 sps:$4 sm:$0xff]  }
  0x31   : > { %v348_v23 = vld [vmem:[%s6041_s2] sm:$0xf] }
  0x32   : > { %1340 = vmatpush1.bf16.msra.mxu0 %v4086_v40  ;;  %1383 = vmatpush1.bf16.msra.mxu1 %v4089_v41  ;;  %v357_v26 = vrot.slane %v348_v23, %v4936_v19  ;;  %v365_v27 = vrot.slane %v348_v23, %v4938_v20  ;;  %v353_v28 = vrot.slane %v348_v23, %v4940_v21 }
  0x33   : > { %1341 = vmatprep.subr.bf16.mxu0 %v4094_v42  ;;  %1384 = vmatprep.subr.bf16.mxu1 %v4097_v43  ;;  %v361_v29 = vrot.slane %v348_v23, %v4942_v22  ;;  %v4190_v23 = vld [vmem:[%s6042_s3 + $0xc] ss:$16 sps:$4 sm:$0xff]  }
  0x36   : > { %1342 = vmatpush1.bf16.msra.mxu0 %v4092_v44  ;;  %1385 = vmatpush1.bf16.msra.mxu1 %v4095_v45 }
  0x37   : > { %1343 = vmatprep.subr.bf16.mxu0 %v4100_v46  ;;  %1386 = vmatprep.subr.bf16.mxu1 %v4103_v47 }
  0x3a   : > { %1344 = vmatpush2.bf16.msra.mxu0 %v4098_v48  ;;  %1387 = vmatpush2.bf16.msra.mxu1 %v4101_v49 }
  0x3b   : > { %1345 = vmatprep.subr.bf16.mxu0 %v4106_v50  ;;  %1388 = vmatprep.subr.bf16.mxu1 %v4109_v51 }
  0x3e   : > { %1346 = vmatpush2.bf16.msra.mxu0 %v4104_v52  ;;  %1389 = vmatpush2.bf16.msra.mxu1 %v4107_v53 }
  0x3f   : > { %1347 = vmatprep.subr.bf16.mxu0 %v4112_v54  ;;  %1390 = vmatprep.subr.bf16.mxu1 %v4115_v55  ;;  %v4146_v54 = vld [vmem:[%s6042_s3 + $0xe8] ss:$16 sps:$4 sm:$0xff]  }
  0x40   : > { %v4149_v55 = vld [vmem:[%s6042_s3 + $0x2e8] ss:$16 sps:$4 sm:$0xff]  }
  0x42   : > { %1348 = vmatpush2.bf16.msra.mxu0 %v4110_v56  ;;  %1391 = vmatpush2.bf16.msra.mxu1 %v4113_v57 }
  0x43   : > { %1349 = vmatprep.subr.bf16.mxu0 %v4118_v58  ;;  %1392 = vmatprep.subr.bf16.mxu1 %v4121_v59  ;;  %v4154_v58 = vld [vmem:[%s6042_s3 + $0xcc] ss:$16 sps:$4 sm:$0xff]  }
  0x44   : > { %v4157_v59 = vld [vmem:[%s6042_s3 + $0x2cc] ss:$16 sps:$4 sm:$0xff]  }
  0x46   : > { %1350 = vmatpush2.bf16.msra.mxu0 %v4116_v60  ;;  %1393 = vmatpush2.bf16.msra.mxu1 %v4119_v61  ;;  %v4152_v60 = vld [vmem:[%s6042_s3 + $0xc8] ss:$16 sps:$4 sm:$0xff]  }
  0x47   : > { %1351 = vmatprep.subr.bf16.mxu0 %v4124_v62  ;;  %1394 = vmatprep.subr.bf16.mxu1 %v4127_v63  ;;  %v4155_v61 = vld [vmem:[%s6042_s3 + $0x2c8] ss:$16 sps:$4 sm:$0xff]   ;;  %v4160_v62 = vld [vmem:[%s6042_s3 + $0xac] ss:$16 sps:$4 sm:$0xff]  }
  0x48   : > { %v4163_v63 = vld [vmem:[%s6042_s3 + $0x2ac] ss:$16 sps:$4 sm:$0xff]  }
  0x4a   : > { %1352 = vmatpush2.bf16.msra.mxu0 %v4122_v0  ;;  %1395 = vmatpush2.bf16.msra.mxu1 %v4125_v1  ;;  %v4158_v0 = vld [vmem:[%s6042_s3 + $0xa8] ss:$16 sps:$4 sm:$0xff]  }
  0x4b   : > { %1353 = vmatprep.subr.bf16.mxu0 %v4130_v3  ;;  %1396 = vmatprep.subr.bf16.mxu1 %v4133_v4  ;;  %v4161_v1 = vld [vmem:[%s6042_s3 + $0x2a8] ss:$16 sps:$4 sm:$0xff]   ;;  %v4166_v3 = vld [vmem:[%s6042_s3 + $0x8c] ss:$16 sps:$4 sm:$0xff]  }
  0x4c   : > { %v4169_v4 = vld [vmem:[%s6042_s3 + $0x28c] ss:$16 sps:$4 sm:$0xff]  }
  0x4e   : > { %1354 = vmatpush2.bf16.msra.mxu0 %v4128_v5  ;;  %1397 = vmatpush2.bf16.msra.mxu1 %v4131_v6  ;;  %v4164_v5 = vld [vmem:[%s6042_s3 + $0x88] ss:$16 sps:$4 sm:$0xff]  }
  0x4f   : > { %1355 = vmatprep.subr.bf16.mxu0 %v4136_v7  ;;  %1398 = vmatprep.subr.bf16.mxu1 %v4139_v8  ;;  %v4167_v6 = vld [vmem:[%s6042_s3 + $0x288] ss:$16 sps:$4 sm:$0xff]   ;;  %v4172_v7 = vld [vmem:[%s6042_s3 + $0x6c] ss:$16 sps:$4 sm:$0xff]  }
  0x50   : > { %v4175_v8 = vld [vmem:[%s6042_s3 + $0x26c] ss:$16 sps:$4 sm:$0xff]  }
  0x52   : > { %1356 = vmatpush2.bf16.msra.mxu0 %v4134_v9  ;;  %1399 = vmatpush2.bf16.msra.mxu1 %v4137_v10  ;;  %v4170_v9 = vld [vmem:[%s6042_s3 + $0x68] ss:$16 sps:$4 sm:$0xff]  }
  0x53   : > { %1357 = vmatprep.subr.bf16.mxu0 %v4142_v11  ;;  %1400 = vmatprep.subr.bf16.mxu1 %v4145_v12  ;;  %v4173_v10 = vld [vmem:[%s6042_s3 + $0x268] ss:$16 sps:$4 sm:$0xff]   ;;  %v4178_v11 = vld [vmem:[%s6042_s3 + $0x4c] ss:$16 sps:$4 sm:$0xff]  }
  0x54   : > { %v4181_v12 = vld [vmem:[%s6042_s3 + $0x24c] ss:$16 sps:$4 sm:$0xff]  }
  0x56   : > { %1358 = vmatpush2.bf16.msra.mxu0 %v4140_v13  ;;  %1401 = vmatpush2.bf16.msra.mxu1 %v4143_v14  ;;  %v4176_v13 = vld [vmem:[%s6042_s3 + $0x48] ss:$16 sps:$4 sm:$0xff]  }
  0x57   : > { %1413 = vmatprep.subr.bf16.mxu0 %v4148_v15  ;;  %1456 = vmatprep.subr.bf16.mxu1 %v4151_v16  ;;  %v4179_v14 = vld [vmem:[%s6042_s3 + $0x248] ss:$16 sps:$4 sm:$0xff]   ;;  %v4184_v15 = vld [vmem:[%s6042_s3 + $0x2c] ss:$16 sps:$4 sm:$0xff]  }
  0x58   : > { %v4187_v16 = vld [vmem:[%s6042_s3 + $0x22c] ss:$16 sps:$4 sm:$0xff]  }
  0xd9   : > { %v473_v24 = vpop.f32.mrf.mxu0  ;;  %v516_v25 = vpop.f32.mrf.mxu1 }
  0xda   : > { %v4959_v38 = vadd.f32 %v473_v24, %v353_v28  ;;  %v4961_v39 = vadd.f32 %v516_v25, %v361_v29  ;;  %v4193_v24 = vld [vmem:[%s6042_s3 + $0x20c] ss:$16 sps:$4 sm:$0xff]   ;;  %v4188_v25 = vld [vmem:[%s6042_s3 + $0x8] ss:$16 sps:$4 sm:$0xff]  }
  0xdb   : > { %v475_v30 = vpop.f32.mrf.mxu0  ;;  %v518_v31 = vpop.f32.mrf.mxu1 }
  0xdc   : > { %v4951_v34 = vadd.f32 %v475_v30, %v357_v26  ;;  %v4953_v35 = vadd.f32 %v518_v31, %v365_v27  ;;  %v525_v50 = vmax.f32 %v4959_v38, 0.0  ;;  %v527_v51 = vmax.f32 %v4961_v39, 0.0  ;;  %v4197_v30 = vld [vmem:[%s6042_s3 + $0x3e8] ss:$16 sps:$4 sm:$0xff]   ;;  %v4202_v31 = vld [vmem:[%s6042_s3 + $0x1cc] ss:$16 sps:$4 sm:$0xff]  }
  0xdd   : > { %v477_v32 = vpop.f32.mrf.mxu0  ;;  %v520_v33 = vpop.f32.mrf.mxu1 }
  0xde   : > { %v4955_v36 = vadd.f32 %v477_v32, %v353_v28  ;;  %v4957_v37 = vadd.f32 %v520_v33, %v361_v29  ;;  %v526_v46 = vmax.f32 %v4951_v34, 0.0  ;;  %v528_v47 = vmax.f32 %v4953_v35, 0.0  ;;  %v4199_v28 = vld [vmem:[%s6042_s3 + $0x3ec] ss:$16 sps:$4 sm:$0xff]   ;;  %v4194_v29 = vld [vmem:[%s6042_s3 + $0x1e8] ss:$16 sps:$4 sm:$0xff]  }
  0xdf   : > { %v479_v40 = vpop.f32.mrf.mxu0  ;;  %v522_v41 = vpop.f32.mrf.mxu1  ;;  %v4205_v32 = vld [vmem:[%s6042_s3 + $0x3cc] ss:$16 sps:$4 sm:$0xff]   ;;  %v4200_v33 = vld [vmem:[%s6042_s3 + $0x1c8] ss:$16 sps:$4 sm:$0xff]  }
  0xe0   : > { %v4963_v42 = vadd.f32 %v479_v40, %v357_v26  ;;  %v4965_v43 = vadd.f32 %v522_v41, %v365_v27  ;;  %v529_v44 = vmax.f32 %v4955_v36, 0.0  ;;  %v531_v45 = vmax.f32 %v4957_v37, 0.0  ;;  %v4191_v26 = vld [vmem:[%s6042_s3 + $0x208] ss:$16 sps:$4 sm:$0xff]   ;;  %v4196_v27 = vld [vmem:[%s6042_s3 + $0x1ec] ss:$16 sps:$4 sm:$0xff]  }
  0xe1   : > { %v4203_v40 = vld [vmem:[%s6042_s3 + $0x3c8] ss:$16 sps:$4 sm:$0xff]   ;;  %v4208_v41 = vld [vmem:[%s6042_s3 + $0x1ac] ss:$16 sps:$4 sm:$0xff]   ;;  %v5615_v36 = vld [vmem:[%s6046_s7] sm:$0x7f]  }
  0xe2   : > { %v530_v48 = vmax.f32 %v4963_v42, 0.0  ;;  %v532_v49 = vmax.f32 %v4965_v43, 0.0  ;;  %v4993_v56 = vpack.c.bf16 %v529_v44, %v525_v50  ;;  %v4999_v57 = vpack.c.bf16 %v531_v45, %v527_v51  ;;  %v4435_v42 = vld [vmem:[%s6047_s8 + $0xe0] ss:$16 sps:$4 sm:$0xff]   ;;  %v4479_v43 = vld [vmem:[%s6047_s8 + $0x124] ss:$16 sps:$4 sm:$0xff]  }
  0xe3   : > { %v4477_v37 = vld [vmem:[%s6047_s8 + $0x120] ss:$16 sps:$4 sm:$0xff]  }
  0xe4   : > { %v534_v52 = vpack.c.bf16 %v530_v48, %v526_v46  ;;  %v536_v53 = vpack.c.bf16 %v532_v49, %v528_v47 }
  0xe6   : > { %1359 = vmatprep.mubr.bf16.mxu0 %v534_v52  ;;  %1402 = vmatprep.mubr.bf16.mxu1 %v536_v53 }
  0xe7   : > { %1360 = vmatmul.mubr.bf16.vlgmr.msra.gmra.mxu0 %v4993_v56  ;;  %1403 = vmatmul.mubr.bf16.vlgmr.msra.gmra.mxu1 %v4999_v57 }
  0xe8   : > { %1414 = vmatpush1.bf16.msra.mxu0 %v4146_v54  ;;  %1457 = vmatpush1.bf16.msra.mxu1 %v4149_v55  ;;  %v4209_v54 = vld [vmem:[%s6042_s3 + $0x3a8] ss:$16 sps:$4 sm:$0xff]   ;;  %v4214_v55 = vld [vmem:[%s6042_s3 + $0x18c] ss:$16 sps:$4 sm:$0xff]  }
  0xe9   : > { %1445 = vmatprep.mubr.bf16.mxu0 %v534_v52  ;;  %1488 = vmatprep.mubr.bf16.mxu1 %v536_v53  ;;  %v4211_v52 = vld [vmem:[%s6042_s3 + $0x3ac] ss:$16 sps:$4 sm:$0xff]   ;;  %v4206_v53 = vld [vmem:[%s6042_s3 + $0x1a8] ss:$16 sps:$4 sm:$0xff]  }
  0xea   : > { %1415 = vmatprep.subr.bf16.mxu0 %v4154_v58  ;;  %1458 = vmatprep.subr.bf16.mxu1 %v4157_v59  ;;  %v4217_v58 = vld [vmem:[%s6042_s3 + $0x38c] ss:$16 sps:$4 sm:$0xff]   ;;  %v4212_v59 = vld [vmem:[%s6042_s3 + $0x188] ss:$16 sps:$4 sm:$0xff]  }
  0xec   : > { %1416 = vmatpush1.bf16.msra.mxu0 %v4152_v60  ;;  %1459 = vmatpush1.bf16.msra.mxu1 %v4155_v61  ;;  %v4215_v60 = vld [vmem:[%s6042_s3 + $0x388] ss:$16 sps:$4 sm:$0xff]   ;;  %v4220_v61 = vld [vmem:[%s6042_s3 + $0x16c] ss:$16 sps:$4 sm:$0xff]  }
  0xed   : > { %1417 = vmatprep.subr.bf16.mxu0 %v4160_v62  ;;  %1460 = vmatprep.subr.bf16.mxu1 %v4163_v63  ;;  %v4223_v62 = vld [vmem:[%s6042_s3 + $0x36c] ss:$16 sps:$4 sm:$0xff]   ;;  %v4218_v63 = vld [vmem:[%s6042_s3 + $0x168] ss:$16 sps:$4 sm:$0xff]  }
  0xf0   : > { %1418 = vmatpush1.bf16.msra.mxu0 %v4158_v0  ;;  %1461 = vmatpush1.bf16.msra.mxu1 %v4161_v1  ;;  %v4221_v0 = vld [vmem:[%s6042_s3 + $0x368] ss:$16 sps:$4 sm:$0xff]   ;;  %v4226_v1 = vld [vmem:[%s6042_s3 + $0x14c] ss:$16 sps:$4 sm:$0xff]  }
  0xf1   : > { %1419 = vmatprep.subr.bf16.mxu0 %v4166_v3  ;;  %1462 = vmatprep.subr.bf16.mxu1 %v4169_v4  ;;  %v4229_v3 = vld [vmem:[%s6042_s3 + $0x34c] ss:$16 sps:$4 sm:$0xff]   ;;  %v4224_v4 = vld [vmem:[%s6042_s3 + $0x148] ss:$16 sps:$4 sm:$0xff]  }
  0xf4   : > { %1420 = vmatpush1.bf16.msra.mxu0 %v4164_v5  ;;  %1463 = vmatpush1.bf16.msra.mxu1 %v4167_v6  ;;  %v4227_v5 = vld [vmem:[%s6042_s3 + $0x348] ss:$16 sps:$4 sm:$0xff]   ;;  %v4232_v6 = vld [vmem:[%s6042_s3 + $0x12c] ss:$16 sps:$4 sm:$0xff]  }
  0xf5   : > { %1421 = vmatprep.subr.bf16.mxu0 %v4172_v7  ;;  %1464 = vmatprep.subr.bf16.mxu1 %v4175_v8  ;;  %v4235_v7 = vld [vmem:[%s6042_s3 + $0x32c] ss:$16 sps:$4 sm:$0xff]   ;;  %v4230_v8 = vld [vmem:[%s6042_s3 + $0x128] ss:$16 sps:$4 sm:$0xff]  }
  0xf8   : > { %1422 = vmatpush1.bf16.msra.mxu0 %v4170_v9  ;;  %1465 = vmatpush1.bf16.msra.mxu1 %v4173_v10  ;;  %v4233_v9 = vld [vmem:[%s6042_s3 + $0x328] ss:$16 sps:$4 sm:$0xff]   ;;  %v4238_v10 = vld [vmem:[%s6042_s3 + $0x10c] ss:$16 sps:$4 sm:$0xff]  }
  0xf9   : > { %1423 = vmatprep.subr.bf16.mxu0 %v4178_v11  ;;  %1466 = vmatprep.subr.bf16.mxu1 %v4181_v12  ;;  %v4241_v11 = vld [vmem:[%s6042_s3 + $0x30c] ss:$16 sps:$4 sm:$0xff]   ;;  %v4236_v12 = vld [vmem:[%s6042_s3 + $0x108] ss:$16 sps:$4 sm:$0xff]  }
  0xfc   : > { %1424 = vmatpush1.bf16.msra.mxu0 %v4176_v13  ;;  %1467 = vmatpush1.bf16.msra.mxu1 %v4179_v14  ;;  %v4239_v13 = vld [vmem:[%s6042_s3 + $0x308] ss:$16 sps:$4 sm:$0xff]   ;;  %v4244_v14 = vld [vmem:[%s6044_s5 + $0xe4] ss:$16 sps:$4 sm:$0xff]  }
  0xfd   : > { %1425 = vmatprep.subr.bf16.mxu0 %v4184_v15  ;;  %1468 = vmatprep.subr.bf16.mxu1 %v4187_v16  ;;  %v4242_v15 = vld [vmem:[%s6044_s5 + $0xe0] ss:$16 sps:$4 sm:$0xff]   ;;  %v4247_v16 = vld [vmem:[%s6044_s5 + $0xc4] ss:$16 sps:$4 sm:$0xff]  }
 0x100   : > { %1426 = vmatpush1.bf16.msra.mxu0 %v4182_v17  ;;  %1469 = vmatpush1.bf16.msra.mxu1 %v4185_v18  ;;  %v4245_v17 = vld [vmem:[%s6044_s5 + $0xc0] ss:$16 sps:$4 sm:$0xff]   ;;  %v4250_v18 = vld [vmem:[%s6044_s5 + $0xa4] ss:$16 sps:$4 sm:$0xff]  }
 0x101   : > { %1427 = vmatprep.subr.bf16.mxu0 %v4190_v23  ;;  %1470 = vmatprep.subr.bf16.mxu1 %v4193_v24  ;;  %v4248_v23 = vld [vmem:[%s6044_s5 + $0xa0] ss:$16 sps:$4 sm:$0xff]   ;;  %v4256_v24 = vld [vmem:[%s6044_s5 + $0x64] ss:$16 sps:$4 sm:$0xff]  }
 0x104   : > { %1428 = vmatpush1.bf16.msra.mxu0 %v4188_v25  ;;  %1471 = vmatpush1.bf16.msra.mxu1 %v4191_v26  ;;  %v4254_v25 = vld [vmem:[%s6044_s5 + $0x60] ss:$16 sps:$4 sm:$0xff]  }
 0x105   : > { %1429 = vmatprep.subr.bf16.mxu0 %v4196_v27  ;;  %1472 = vmatprep.subr.bf16.mxu1 %v4199_v28  ;;  %v4290_v26 = vld [vmem:[%s6044_s5 + $0x2e0] ss:$16 sps:$4 sm:$0xff]   ;;  %v4292_v27 = vld [vmem:[%s6044_s5 + $0x2e4] ss:$16 sps:$4 sm:$0xff]  }
 0x106   : > { %v4259_v28 = vld [vmem:[%s6044_s5 + $0x44] ss:$16 sps:$4 sm:$0xff]  }
 0x108   : > { %1430 = vmatpush2.bf16.msra.mxu0 %v4194_v29  ;;  %1473 = vmatpush2.bf16.msra.mxu1 %v4197_v30  ;;  %v4257_v29 = vld [vmem:[%s6044_s5 + $0x40] ss:$16 sps:$4 sm:$0xff]  }
 0x109   : > { %1431 = vmatprep.subr.bf16.mxu0 %v4202_v31  ;;  %1474 = vmatprep.subr.bf16.mxu1 %v4205_v32  ;;  %v4296_v30 = vld [vmem:[%s6044_s5 + $0x2c0] ss:$16 sps:$4 sm:$0xff]   ;;  %v4298_v31 = vld [vmem:[%s6044_s5 + $0x2c4] ss:$16 sps:$4 sm:$0xff]  }
 0x10a   : > { %v4262_v32 = vld [vmem:[%s6044_s5 + $0x24] ss:$16 sps:$4 sm:$0xff]  }
 0x10c   : > { %1432 = vmatpush2.bf16.msra.mxu0 %v4200_v33  ;;  %1475 = vmatpush2.bf16.msra.mxu1 %v4203_v40  ;;  %v4260_v33 = vld [vmem:[%s6044_s5 + $0x20] ss:$16 sps:$4 sm:$0xff]  }
 0x10d   : > { %1433 = vmatprep.subr.bf16.mxu0 %v4208_v41  ;;  %1476 = vmatprep.subr.bf16.mxu1 %v4211_v52  ;;  %v4302_v40 = vld [vmem:[%s6044_s5 + $0x2a0] ss:$16 sps:$4 sm:$0xff]   ;;  %v4304_v41 = vld [vmem:[%s6044_s5 + $0x2a4] ss:$16 sps:$4 sm:$0xff]  }
 0x10e   : > { %v4265_v52 = vld [vmem:[%s6044_s5 + $0x4] ss:$16 sps:$4 sm:$0xff]  }
 0x110   : > { %1434 = vmatpush2.bf16.msra.mxu0 %v4206_v53  ;;  %1477 = vmatpush2.bf16.msra.mxu1 %v4209_v54  ;;  %v4263_v53 = vld [vmem:[%s6044_s5] ss:$16 sps:$4 sm:$0xff]  }
 0x111   : > { %1435 = vmatprep.subr.bf16.mxu0 %v4214_v55  ;;  %1478 = vmatprep.subr.bf16.mxu1 %v4217_v58  ;;  %v4308_v54 = vld [vmem:[%s6044_s5 + $0x280] ss:$16 sps:$4 sm:$0xff]   ;;  %v4310_v55 = vld [vmem:[%s6044_s5 + $0x284] ss:$16 sps:$4 sm:$0xff]  }
 0x112   : > { %v4268_v58 = vld [vmem:[%s6044_s5 + $0x1e4] ss:$16 sps:$4 sm:$0xff]  }
 0x114   : > { %1436 = vmatpush2.bf16.msra.mxu0 %v4212_v59  ;;  %1479 = vmatpush2.bf16.msra.mxu1 %v4215_v60  ;;  %v4266_v59 = vld [vmem:[%s6044_s5 + $0x1e0] ss:$16 sps:$4 sm:$0xff]  }
 0x115   : > { %1437 = vmatprep.subr.bf16.mxu0 %v4220_v61  ;;  %1480 = vmatprep.subr.bf16.mxu1 %v4223_v62  ;;  %v4314_v60 = vld [vmem:[%s6044_s5 + $0x260] ss:$16 sps:$4 sm:$0xff]   ;;  %v4316_v61 = vld [vmem:[%s6044_s5 + $0x264] ss:$16 sps:$4 sm:$0xff]  }
 0x116   : > { %v4271_v62 = vld [vmem:[%s6044_s5 + $0x1c4] ss:$16 sps:$4 sm:$0xff]  }
 0x118   : > { %1438 = vmatpush2.bf16.msra.mxu0 %v4218_v63  ;;  %1481 = vmatpush2.bf16.msra.mxu1 %v4221_v0  ;;  %v4269_v63 = vld [vmem:[%s6044_s5 + $0x1c0] ss:$16 sps:$4 sm:$0xff]  }
 0x119   : > { %1439 = vmatprep.subr.bf16.mxu0 %v4226_v1  ;;  %1482 = vmatprep.subr.bf16.mxu1 %v4229_v3  ;;  %v4320_v0 = vld [vmem:[%s6044_s5 + $0x240] ss:$16 sps:$4 sm:$0xff]   ;;  %v4322_v1 = vld [vmem:[%s6044_s5 + $0x244] ss:$16 sps:$4 sm:$0xff]  }
 0x11a   : > { %v4274_v3 = vld [vmem:[%s6044_s5 + $0x1a4] ss:$16 sps:$4 sm:$0xff]  }
 0x11c   : > { %1440 = vmatpush2.bf16.msra.mxu0 %v4224_v4  ;;  %1483 = vmatpush2.bf16.msra.mxu1 %v4227_v5  ;;  %v4272_v4 = vld [vmem:[%s6044_s5 + $0x1a0] ss:$16 sps:$4 sm:$0xff]  }
 0x11d   : > { %1441 = vmatprep.subr.bf16.mxu0 %v4232_v6  ;;  %1484 = vmatprep.subr.bf16.mxu1 %v4235_v7  ;;  %v4326_v5 = vld [vmem:[%s6044_s5 + $0x220] ss:$16 sps:$4 sm:$0xff]   ;;  %v4328_v6 = vld [vmem:[%s6044_s5 + $0x224] ss:$16 sps:$4 sm:$0xff]  }
 0x11e   : > { %v4277_v7 = vld [vmem:[%s6044_s5 + $0x184] ss:$16 sps:$4 sm:$0xff]  }
 0x120   : > { %1442 = vmatpush2.bf16.msra.mxu0 %v4230_v8  ;;  %1485 = vmatpush2.bf16.msra.mxu1 %v4233_v9  ;;  %v4275_v8 = vld [vmem:[%s6044_s5 + $0x180] ss:$16 sps:$4 sm:$0xff]  }
 0x121   : > { %1443 = vmatprep.subr.bf16.mxu0 %v4238_v10  ;;  %1486 = vmatprep.subr.bf16.mxu1 %v4241_v11  ;;  %v4332_v9 = vld [vmem:[%s6044_s5 + $0x200] ss:$16 sps:$4 sm:$0xff]   ;;  %v4334_v10 = vld [vmem:[%s6044_s5 + $0x204] ss:$16 sps:$4 sm:$0xff]  }
 0x122   : > { %v4280_v11 = vld [vmem:[%s6044_s5 + $0x164] ss:$16 sps:$4 sm:$0xff]  }
 0x124   : > { %1444 = vmatpush2.bf16.msra.mxu0 %v4236_v12  ;;  %1487 = vmatpush2.bf16.msra.mxu1 %v4239_v13  ;;  %v4278_v12 = vld [vmem:[%s6044_s5 + $0x160] ss:$16 sps:$4 sm:$0xff]  }
 0x125   : > { %2279 = vmatprep.subr.bf16.mxu0 %v4244_v14  ;;  %2322 = vmatprep.subr.bf16.mxu1 %v4292_v27  ;;  %v4338_v13 = vld [vmem:[%s6044_s5 + $0x3e0] ss:$16 sps:$4 sm:$0xff]   ;;  %v4340_v14 = vld [vmem:[%s6044_s5 + $0x3e4] ss:$16 sps:$4 sm:$0xff]  }
 0x126   : > { %v4356_v27 = vld [vmem:[%s6044_s5 + $0x380] ss:$16 sps:$4 sm:$0xff]  }
 0x127   : > { %1446 = vmatmul.mubr.bf16.vlgmr.msra.gmra.mxu0 %v4993_v56  ;;  %1489 = vmatmul.mubr.bf16.vlgmr.msra.gmra.mxu1 %v4999_v57  ;;  %v4253_v56 = vld [vmem:[%s6044_s5 + $0x84] ss:$16 sps:$4 sm:$0xff]   ;;  %v4251_v57 = vld [vmem:[%s6044_s5 + $0x80] ss:$16 sps:$4 sm:$0xff]  }
 0x128   : > { %2280 = vmatpush1.bf16.msra.mxu0 %v4242_v15  ;;  %2323 = vmatpush1.bf16.msra.mxu1 %v4290_v26  ;;  %v4283_v15 = vld [vmem:[%s6044_s5 + $0x144] ss:$16 sps:$4 sm:$0xff]   ;;  %v4287_v26 = vld [vmem:[%s6044_s5 + $0x100] ss:$16 sps:$4 sm:$0xff]  }
 0x129   : > { %2281 = vmatprep.subr.bf16.mxu0 %v4247_v16  ;;  %2324 = vmatprep.subr.bf16.mxu1 %v4298_v31  ;;  %v4281_v16 = vld [vmem:[%s6044_s5 + $0x140] ss:$16 sps:$4 sm:$0xff]   ;;  %v4364_v31 = vld [vmem:[%s6044_s5 + $0x364] ss:$16 sps:$4 sm:$0xff]  }
 0x12c   : > { %2282 = vmatpush1.bf16.msra.mxu0 %v4245_v17  ;;  %2325 = vmatpush1.bf16.msra.mxu1 %v4296_v30  ;;  %v4344_v17 = vld [vmem:[%s6044_s5 + $0x3c0] ss:$16 sps:$4 sm:$0xff]  }
 0x12d   : > { %2283 = vmatprep.subr.bf16.mxu0 %v4250_v18  ;;  %2326 = vmatprep.subr.bf16.mxu1 %v4304_v41  ;;  %v4346_v18 = vld [vmem:[%s6044_s5 + $0x3c4] ss:$16 sps:$4 sm:$0xff]   ;;  %v4362_v30 = vld [vmem:[%s6044_s5 + $0x360] ss:$16 sps:$4 sm:$0xff]  }
 0x12e   : > { %v4374_v41 = vld [vmem:[%s6044_s5 + $0x320] ss:$16 sps:$4 sm:$0xff]  }
 0x130   : > { %2284 = vmatpush1.bf16.msra.mxu0 %v4248_v23  ;;  %2327 = vmatpush1.bf16.msra.mxu1 %v4302_v40  ;;  %v4286_v23 = vld [vmem:[%s6044_s5 + $0x124] ss:$16 sps:$4 sm:$0xff]  }
 0x131   : > { %2285 = vmatprep.subr.bf16.mxu0 %v4253_v56  ;;  %2328 = vmatprep.subr.bf16.mxu1 %v4310_v55  ;;  %v4284_v56 = vld [vmem:[%s6044_s5 + $0x120] ss:$16 sps:$4 sm:$0xff]   ;;  %v4376_v40 = vld [vmem:[%s6044_s5 + $0x324] ss:$16 sps:$4 sm:$0xff]  }
 0x132   : > { %v5386_v55 = vld [vmem:[%s6043_s4] sm:$0xf] }
 0x134   : > { %2286 = vmatpush1.bf16.msra.mxu0 %v4251_v57  ;;  %2329 = vmatpush1.bf16.msra.mxu1 %v4308_v54  ;;  %v4350_v57 = vld [vmem:[%s6044_s5 + $0x3a0] ss:$16 sps:$4 sm:$0xff]   ;;  %v4388_v54 = vld [vmem:[%s6044_s5 + $0x2ec] ss:$16 sps:$4 sm:$0xff]  }
 0x135   : > { %2287 = vmatprep.subr.bf16.mxu0 %v4256_v24  ;;  %2330 = vmatprep.subr.bf16.mxu1 %v4316_v61  ;;  %v4352_v24 = vld [vmem:[%s6044_s5 + $0x3a4] ss:$16 sps:$4 sm:$0xff]  }
 0x138   : > { %2288 = vmatpush1.bf16.msra.mxu0 %v4254_v25  ;;  %2331 = vmatpush1.bf16.msra.mxu1 %v4314_v60  ;;  %v4289_v25 = vld [vmem:[%s6044_s5 + $0x104] ss:$16 sps:$4 sm:$0xff]  }
 0x139   : > { %2289 = vmatprep.subr.bf16.mxu0 %v4259_v28  ;;  %2332 = vmatprep.subr.bf16.mxu1 %v4322_v1  ;;  %v4358_v28 = vld [vmem:[%s6044_s5 + $0x384] ss:$16 sps:$4 sm:$0xff]  }
 0x13c   : > { %2290 = vmatpush1.bf16.msra.mxu0 %v4257_v29  ;;  %2333 = vmatpush1.bf16.msra.mxu1 %v4320_v0  ;;  %v4295_v29 = vld [vmem:[%s6044_s5 + $0xec] ss:$16 sps:$4 sm:$0xff]  }
 0x13d   : > { %2291 = vmatprep.subr.bf16.mxu0 %v4262_v32  ;;  %2334 = vmatprep.subr.bf16.mxu1 %v4328_v6  ;;  %v4370_v32 = vld [vmem:[%s6044_s5 + $0x344] ss:$16 sps:$4 sm:$0xff]  }
 0x140   : > { %2292 = vmatpush1.bf16.msra.mxu0 %v4260_v33  ;;  %2335 = vmatpush1.bf16.msra.mxu1 %v4326_v5  ;;  %v4368_v33 = vld [vmem:[%s6044_s5 + $0x340] ss:$16 sps:$4 sm:$0xff]  }
 0x141   : > { %2293 = vmatprep.subr.bf16.mxu0 %v4265_v52  ;;  %2336 = vmatprep.subr.bf16.mxu1 %v4334_v10  ;;  %v4382_v52 = vld [vmem:[%s6044_s5 + $0x304] ss:$16 sps:$4 sm:$0xff]  }
 0x144   : > { %2294 = vmatpush1.bf16.msra.mxu0 %v4263_v53  ;;  %2337 = vmatpush1.bf16.msra.mxu1 %v4332_v9  ;;  %v4380_v53 = vld [vmem:[%s6044_s5 + $0x300] ss:$16 sps:$4 sm:$0xff]  }
 0x145   : > { %2295 = vmatprep.subr.bf16.mxu0 %v4268_v58  ;;  %2338 = vmatprep.subr.bf16.mxu1 %v4340_v14  ;;  %v674_v58 = vrot.slane %v5386_v55, %v4936_v19 }
 0x148   : > { %2296 = vmatpush2.bf16.msra.mxu0 %v4266_v59  ;;  %2339 = vmatpush2.bf16.msra.mxu1 %v4338_v13  ;;  %v670_v59 = vrot.slane %v5386_v55, %v4940_v21 }
 0x149   : > { %2297 = vmatprep.subr.bf16.mxu0 %v4271_v62  ;;  %2340 = vmatprep.subr.bf16.mxu1 %v4346_v18  ;;  %v4293_v18 = vld [vmem:[%s6044_s5 + $0xe8] ss:$16 sps:$4 sm:$0xff]  }
 0x14c   : > { %2298 = vmatpush2.bf16.msra.mxu0 %v4269_v63  ;;  %2341 = vmatpush2.bf16.msra.mxu1 %v4344_v17 }
 0x14d   : > { %2299 = vmatprep.subr.bf16.mxu0 %v4274_v3  ;;  %2342 = vmatprep.subr.bf16.mxu1 %v4352_v24  ;;  %v4307_v24 = vld [vmem:[%s6044_s5 + $0xac] ss:$16 sps:$4 sm:$0xff]  }
 0x150   : > { %2300 = vmatpush2.bf16.msra.mxu0 %v4272_v4  ;;  %2343 = vmatpush2.bf16.msra.mxu1 %v4350_v57  ;;  %v4299_v57 = vld [vmem:[%s6044_s5 + $0xc8] ss:$16 sps:$4 sm:$0xff]  }
 0x151   : > { %2301 = vmatprep.subr.bf16.mxu0 %v4277_v7  ;;  %2344 = vmatprep.subr.bf16.mxu1 %v4358_v28  ;;  %v4319_v28 = vld [vmem:[%s6044_s5 + $0x6c] ss:$16 sps:$4 sm:$0xff]  }
 0x154   : > { %2302 = vmatpush2.bf16.msra.mxu0 %v4275_v8  ;;  %2345 = vmatpush2.bf16.msra.mxu1 %v4356_v27  ;;  %v4311_v27 = vld [vmem:[%s6044_s5 + $0x88] ss:$16 sps:$4 sm:$0xff]  }
 0x155   : > { %2303 = vmatprep.subr.bf16.mxu0 %v4280_v11  ;;  %2346 = vmatprep.subr.bf16.mxu1 %v4364_v31  ;;  %v4323_v31 = vld [vmem:[%s6044_s5 + $0x48] ss:$16 sps:$4 sm:$0xff]  }
 0x158   : > { %2304 = vmatpush2.bf16.msra.mxu0 %v4278_v12  ;;  %2347 = vmatpush2.bf16.msra.mxu1 %v4362_v30  ;;  %v4325_v30 = vld [vmem:[%s6044_s5 + $0x4c] ss:$16 sps:$4 sm:$0xff]  }
 0x159   : > { %2305 = vmatprep.subr.bf16.mxu0 %v4283_v15  ;;  %2348 = vmatprep.subr.bf16.mxu1 %v4370_v32  ;;  %v4331_v32 = vld [vmem:[%s6044_s5 + $0x2c] ss:$16 sps:$4 sm:$0xff]  }
 0x15c   : > { %2306 = vmatpush2.bf16.msra.mxu0 %v4281_v16  ;;  %2349 = vmatpush2.bf16.msra.mxu1 %v4368_v33  ;;  %v4329_v33 = vld [vmem:[%s6044_s5 + $0x28] ss:$16 sps:$4 sm:$0xff]  }
 0x15d   : > { %2307 = vmatprep.subr.bf16.mxu0 %v4286_v23  ;;  %2350 = vmatprep.subr.bf16.mxu1 %v4376_v40  ;;  %v4337_v40 = vld [vmem:[%s6044_s5 + $0xc] ss:$16 sps:$4 sm:$0xff]  }
 0x160   : > { %2308 = vmatpush2.bf16.msra.mxu0 %v4284_v56  ;;  %2351 = vmatpush2.bf16.msra.mxu1 %v4374_v41  ;;  %v4301_v56 = vld [vmem:[%s6044_s5 + $0xcc] ss:$16 sps:$4 sm:$0xff]   ;;  %v4335_v41 = vld [vmem:[%s6044_s5 + $0x8] ss:$16 sps:$4 sm:$0xff]  }
 0x161   : > { %2309 = vmatprep.subr.bf16.mxu0 %v4289_v25  ;;  %2352 = vmatprep.subr.bf16.mxu1 %v4382_v52  ;;  %v4305_v25 = vld [vmem:[%s6044_s5 + $0xa8] ss:$16 sps:$4 sm:$0xff]   ;;  %v4343_v52 = vld [vmem:[%s6044_s5 + $0x1ec] ss:$16 sps:$4 sm:$0xff]  }
 0x164   : > { %2310 = vmatpush2.bf16.msra.mxu0 %v4287_v26  ;;  %2353 = vmatpush2.bf16.msra.mxu1 %v4380_v53  ;;  %v4313_v26 = vld [vmem:[%s6044_s5 + $0x8c] ss:$16 sps:$4 sm:$0xff]   ;;  %v4341_v53 = vld [vmem:[%s6044_s5 + $0x1e8] ss:$16 sps:$4 sm:$0xff]  }
 0x165   : > { %2365 = vmatprep.subr.bf16.mxu0 %v4295_v29  ;;  %2408 = vmatprep.subr.bf16.mxu1 %v4388_v54  ;;  %v4317_v29 = vld [vmem:[%s6044_s5 + $0x68] ss:$16 sps:$4 sm:$0xff]   ;;  %v4349_v54 = vld [vmem:[%s6044_s5 + $0x1cc] ss:$16 sps:$4 sm:$0xff]  }
 0x1a7   : > { %v1361_v60 = vpop.f32.mrf.mxu0  ;;  %v1404_v61 = vpop.f32.mrf.mxu1 }
 0x1a8   : > { %v1362_v1 = vadd.f32 %v1361_v60, %v670_v59  ;;  %v4353_v60 = vld [vmem:[%s6044_s5 + $0x1a8] ss:$16 sps:$4 sm:$0xff]  }
 0x1a9   : > { %v1363_v62 = vpop.f32.mrf.mxu0  ;;  %v1406_v63 = vpop.f32.mrf.mxu1 }
 0x1aa   : > { %v1364_v0 = vadd.f32 %v1363_v62, %v674_v58  ;;  %v1405_v10 = vadd.f32 %v1404_v61, %v1362_v1  ;;  %v4361_v61 = vld [vmem:[%s6044_s5 + $0x18c] ss:$16 sps:$4 sm:$0xff]   ;;  %v4359_v62 = vld [vmem:[%s6044_s5 + $0x188] ss:$16 sps:$4 sm:$0xff]  }
 0x1ab   : > { %v1365_v3 = vpop.f32.mrf.mxu0  ;;  %v1408_v4 = vpop.f32.mrf.mxu1  ;;  %v4373_v1 = vld [vmem:[%s6044_s5 + $0x14c] ss:$16 sps:$4 sm:$0xff]  }
 0x1ac   : > { %v1366_v5 = vadd.f32 %v1365_v3, %v670_v59  ;;  %v1407_v7 = vadd.f32 %v1406_v63, %v1364_v0  ;;  %v1499_v16 = vmax.f32 %v1405_v10, 0.0  ;;  %v4355_v59 = vld [vmem:[%s6044_s5 + $0x1ac] ss:$16 sps:$4 sm:$0xff]   ;;  %v4365_v0 = vld [vmem:[%s6044_s5 + $0x168] ss:$16 sps:$4 sm:$0xff]   ;;  %v682_v3 = vrot.slane %v5386_v55, %v4938_v20 }
 0x1ad   : > { %v1367_v6 = vpop.f32.mrf.mxu0  ;;  %v1410_v11 = vpop.f32.mrf.mxu1  ;;  %v4367_v63 = vld [vmem:[%s6044_s5 + $0x16c] ss:$16 sps:$4 sm:$0xff]  }
 0x1ae   : > { %v1409_v8 = vadd.f32 %v1408_v4, %v1366_v5  ;;  %v1368_v9 = vadd.f32 %v1367_v6, %v674_v58  ;;  %v1500_v14 = vmax.f32 %v1407_v7, 0.0  ;;  %v4347_v58 = vld [vmem:[%s6044_s5 + $0x1c8] ss:$16 sps:$4 sm:$0xff]   ;;  %v678_v4 = vrot.slane %v5386_v55, %v4942_v22  ;;  %v4379_v10 = vld [vmem:[%s6044_s5 + $0x12c] ss:$16 sps:$4 sm:$0xff]  }
 0x1af   : > { %v4371_v7 = vld [vmem:[%s6044_s5 + $0x148] ss:$16 sps:$4 sm:$0xff]  }
 0x1b0   : > { %v1411_v12 = vadd.f32 %v1410_v11, %v1368_v9  ;;  %v1503_v13 = vmax.f32 %v1409_v8, 0.0  ;;  %v4377_v55 = vld [vmem:[%s6044_s5 + $0x128] ss:$16 sps:$4 sm:$0xff]  }
 0x1b2   : > { %v1504_v15 = vmax.f32 %v1411_v12, 0.0  ;;  %v5395_v23 = vpack.c.bf16 %v1503_v13, %v1499_v16 }
 0x1b4   : > { %v1508_v17 = vpack.c.bf16 %v1504_v15, %v1500_v14 }
 0x1b6   : > { %2311 = vmatprep.mubr.bf16.mxu0 %v1508_v17 }
 0x1b7   : > { %2312 = vmatmul.mubr.bf16.vlgmr.msra.gmra.mxu0 %v5395_v23 }
 0x1b8   : > { %2366 = vmatpush1.bf16.msra.mxu0 %v4293_v18  ;;  %2397 = vmatprep.mubr.bf16.mxu0 %v1508_v17  ;;  %v4385_v17 = vld [vmem:[%s6044_s5 + $0x10c] ss:$16 sps:$4 sm:$0xff]  }
 0x1b9   : > { %2367 = vmatprep.subr.bf16.mxu0 %v4301_v56 }
 0x1bc   : > { %2368 = vmatpush1.bf16.msra.mxu0 %v4299_v57 }
 0x1bd   : > { %2369 = vmatprep.subr.bf16.mxu0 %v4307_v24 }
 0x1c0   : > { %2370 = vmatpush1.bf16.msra.mxu0 %v4305_v25 }
 0x1c1   : > { %2371 = vmatprep.subr.bf16.mxu0 %v4313_v26 }
 0x1c4   : > { %2372 = vmatpush1.bf16.msra.mxu0 %v4311_v27  ;;  %v4383_v27 = vld [vmem:[%s6044_s5 + $0x108] ss:$16 sps:$4 sm:$0xff]  }
 0x1c5   : > { %2373 = vmatprep.subr.bf16.mxu0 %v4319_v28 }
 0x1c8   : > { %2374 = vmatpush1.bf16.msra.mxu0 %v4317_v29 }
 0x1c9   : > { %2375 = vmatprep.subr.bf16.mxu0 %v4325_v30 }
 0x1cc   : > { %2376 = vmatpush1.bf16.msra.mxu0 %v4323_v31 }
 0x1cd   : > { %2377 = vmatprep.subr.bf16.mxu0 %v4331_v32 }
 0x1d0   : > { %2378 = vmatpush1.bf16.msra.mxu0 %v4329_v33  ;;  %v4386_v33 = vld [vmem:[%s6044_s5 + $0x2e8] ss:$16 sps:$4 sm:$0xff]  }
 0x1d1   : > { %2379 = vmatprep.subr.bf16.mxu0 %v4337_v40 }
 0x1d4   : > { %2380 = vmatpush1.bf16.msra.mxu0 %v4335_v41  ;;  %v4391_v41 = vld [vmem:[%s6044_s5 + $0x2cc] ss:$16 sps:$4 sm:$0xff]  }
 0x1d5   : > { %2381 = vmatprep.subr.bf16.mxu0 %v4343_v52  ;;  %v4389_v52 = vld [vmem:[%s6044_s5 + $0x2c8] ss:$16 sps:$4 sm:$0xff]  }
 0x1d8   : > { %2382 = vmatpush2.bf16.msra.mxu0 %v4341_v53  ;;  %v4394_v53 = vld [vmem:[%s6044_s5 + $0x2ac] ss:$16 sps:$4 sm:$0xff]  }
 0x1d9   : > { %2383 = vmatprep.subr.bf16.mxu0 %v4349_v54  ;;  %v4392_v54 = vld [vmem:[%s6044_s5 + $0x2a8] ss:$16 sps:$4 sm:$0xff]  }
 0x1dc   : > { %2384 = vmatpush2.bf16.msra.mxu0 %v4347_v58  ;;  %v4395_v58 = vld [vmem:[%s6044_s5 + $0x288] ss:$16 sps:$4 sm:$0xff]  }
 0x1dd   : > { %2385 = vmatprep.subr.bf16.mxu0 %v4355_v59  ;;  %v4400_v59 = vld [vmem:[%s6044_s5 + $0x26c] ss:$16 sps:$4 sm:$0xff]  }
 0x1e0   : > { %2386 = vmatpush2.bf16.msra.mxu0 %v4353_v60  ;;  %v4398_v60 = vld [vmem:[%s6044_s5 + $0x268] ss:$16 sps:$4 sm:$0xff]  }
 0x1e1   : > { %2387 = vmatprep.subr.bf16.mxu0 %v4361_v61  ;;  %v4403_v61 = vld [vmem:[%s6044_s5 + $0x24c] ss:$16 sps:$4 sm:$0xff]  }
 0x1e4   : > { %2388 = vmatpush2.bf16.msra.mxu0 %v4359_v62  ;;  %v4401_v62 = vld [vmem:[%s6044_s5 + $0x248] ss:$16 sps:$4 sm:$0xff]  }
 0x1e5   : > { %2389 = vmatprep.subr.bf16.mxu0 %v4367_v63  ;;  %v4406_v63 = vld [vmem:[%s6044_s5 + $0x22c] ss:$16 sps:$4 sm:$0xff]  }
 0x1e7   : > { %v1447_v5 = vpop.f32.mrf.mxu0  ;;  %v1490_v6 = vpop.f32.mrf.mxu1 }
 0x1e8   : > { %2390 = vmatpush2.bf16.msra.mxu0 %v4365_v0  ;;  %v1448_v12 = vadd.f32 %v1447_v5, %v678_v4  ;;  %v4404_v0 = vld [vmem:[%s6044_s5 + $0x228] ss:$16 sps:$4 sm:$0xff]  }
 0x1e9   : > { %v1449_v8 = vpop.f32.mrf.mxu0  ;;  %v1492_v9 = vpop.f32.mrf.mxu1  ;;  %2391 = vmatprep.subr.bf16.mxu0 %v4373_v1  ;;  %v4409_v1 = vld [vmem:[%s6044_s5 + $0x20c] ss:$16 sps:$4 sm:$0xff]   ;;  %v4410_v5 = vld [vmem:[%s6044_s5 + $0x3e8] ss:$16 sps:$4 sm:$0xff]  }
 0x1ea   : > { %v1450_v11 = vadd.f32 %v1449_v8, %v682_v3  ;;  %v1491_v24 = vadd.f32 %v1490_v6, %v1448_v12  ;;  %v4415_v6 = vld [vmem:[%s6044_s5 + $0x3cc] ss:$16 sps:$4 sm:$0xff]  }
 0x1eb   : > { %v1451_v13 = vpop.f32.mrf.mxu0  ;;  %v1494_v14 = vpop.f32.mrf.mxu1  ;;  %v4418_v8 = vld [vmem:[%s6044_s5 + $0x3ac] ss:$16 sps:$4 sm:$0xff]  }
 0x1ec   : > { %v1452_v15 = vadd.f32 %v1451_v13, %v678_v4  ;;  %2392 = vmatpush2.bf16.msra.mxu0 %v4371_v7  ;;  %v1493_v18 = vadd.f32 %v1492_v9, %v1450_v11  ;;  %v1501_v31 = vmax.f32 %v1491_v24, 0.0  ;;  %v4412_v4 = vld [vmem:[%s6044_s5 + $0x3ec] ss:$16 sps:$4 sm:$0xff]   ;;  %v4413_v7 = vld [vmem:[%s6044_s5 + $0x3c8] ss:$16 sps:$4 sm:$0xff]  }
 0x1ed   : > { %v1453_v16 = vpop.f32.mrf.mxu0  ;;  %2393 = vmatprep.subr.bf16.mxu0 %v4379_v10  ;;  %v1496_v25 = vpop.f32.mrf.mxu1  ;;  %v4416_v9 = vld [vmem:[%s6044_s5 + $0x3a8] ss:$16 sps:$4 sm:$0xff]   ;;  %v4421_v10 = vld [vmem:[%s6044_s5 + $0x38c] ss:$16 sps:$4 sm:$0xff]  }
 0x1ee   : > { %v1495_v56 = vadd.f32 %v1494_v14, %v1452_v15  ;;  %v1454_v57 = vadd.f32 %v1453_v16, %v682_v3  ;;  %v1502_v29 = vmax.f32 %v1493_v18, 0.0  ;;  %v4407_v3 = vld [vmem:[%s6044_s5 + $0x208] ss:$16 sps:$4 sm:$0xff]   ;;  %v4424_v12 = vld [vmem:[%s6044_s5 + $0x36c] ss:$16 sps:$4 sm:$0xff]  }
 0x1ef   : > { %v4419_v11 = vld [vmem:[%s6044_s5 + $0x388] ss:$16 sps:$4 sm:$0xff]   ;;  %v4427_v14 = vld [vmem:[%s6044_s5 + $0x34c] ss:$16 sps:$4 sm:$0xff]  }
 0x1f0   : > { %v1497_v26 = vadd.f32 %v1496_v25, %v1454_v57  ;;  %2394 = vmatpush2.bf16.msra.mxu0 %v4377_v55  ;;  %v1505_v28 = vmax.f32 %v1495_v56, 0.0  ;;  %v4422_v13 = vld [vmem:[%s6044_s5 + $0x368] ss:$16 sps:$4 sm:$0xff]   ;;  %v4430_v55 = vld [vmem:[%s6044_s5 + $0x32c] ss:$16 sps:$4 sm:$0xff]  }
 0x1f1   : > { %2395 = vmatprep.subr.bf16.mxu0 %v4385_v17  ;;  %v4425_v15 = vld [vmem:[%s6044_s5 + $0x348] ss:$16 sps:$4 sm:$0xff]   ;;  %v4433_v17 = vld [vmem:[%s6044_s5 + $0x30c] ss:$16 sps:$4 sm:$0xff]  }
 0x1f2   : > { %v1506_v30 = vmax.f32 %v1497_v26, 0.0  ;;  %v5495_v40 = vpack.c.bf16 %v1505_v28, %v1501_v31  ;;  %v4428_v16 = vld [vmem:[%s6044_s5 + $0x328] ss:$16 sps:$4 sm:$0xff]   ;;  %v5595_v28 = vld [vmem:[%s6045_s6] sm:$0xf] }
 0x1f3   : > { %v4431_v18 = vld [vmem:[%s6044_s5 + $0x308] ss:$16 sps:$4 sm:$0xff]  }
 0x1f4   : > { %v1510_v32 = vpack.c.bf16 %v1506_v30, %v1502_v29  ;;  %2396 = vmatpush2.bf16.msra.mxu0 %v4383_v27 }
 0x1f6   : > { %2354 = vmatprep.mubr.bf16.mxu1 %v1510_v32 }
 0x1f7   : > { %2355 = vmatmul.mubr.bf16.vlgmr.msra.gmra.mxu1 %v5495_v40  ;;  %2398 = vmatmul.mubr.bf16.vlgmr.msra.gmra.mxu0 %v5395_v23  ;;  %v4397_v23 = vld [vmem:[%s6044_s5 + $0x28c] ss:$16 sps:$4 sm:$0xff]  }
 0x1f8   : > { %2409 = vmatpush1.bf16.msra.mxu1 %v4386_v33  ;;  %2440 = vmatprep.mubr.bf16.mxu1 %v1510_v32  ;;  %v2468_v32 = vrot.slane %v5595_v28, %v4936_v19 }
 0x1f9   : > { %2410 = vmatprep.subr.bf16.mxu1 %v4391_v41  ;;  %2544 = vmatprep.mubr.bf16.mxu0 %v4635_v2  ;;  %v2464_v41 = vrot.slane %v5595_v28, %v4940_v21  ;;  %v4437_v21 = vld [vmem:[%s6047_s8 + $0xe4] ss:$16 sps:$4 sm:$0xff]  }
 0x1fc   : > { %2411 = vmatpush1.bf16.msra.mxu1 %v4389_v52 }
 0x1fd   : > { %2412 = vmatprep.subr.bf16.mxu1 %v4394_v53 }
 0x200   : > { %2413 = vmatpush1.bf16.msra.mxu1 %v4392_v54 }
 0x201   : > { %2414 = vmatprep.subr.bf16.mxu1 %v4397_v23 }
 0x204   : > { %2415 = vmatpush1.bf16.msra.mxu1 %v4395_v58 }
 0x205   : > { %2416 = vmatprep.subr.bf16.mxu1 %v4400_v59 }
 0x208   : > { %2417 = vmatpush1.bf16.msra.mxu1 %v4398_v60 }
 0x209   : > { %2418 = vmatprep.subr.bf16.mxu1 %v4403_v61 }
 0x20c   : > { %2419 = vmatpush1.bf16.msra.mxu1 %v4401_v62 }
 0x20d   : > { %2420 = vmatprep.subr.bf16.mxu1 %v4406_v63  ;;  %v4443_v63 = vld [vmem:[%s6047_s8 + $0xa4] ss:$16 sps:$4 sm:$0xff]  }
 0x210   : > { %2421 = vmatpush1.bf16.msra.mxu1 %v4404_v0  ;;  %v4441_v0 = vld [vmem:[%s6047_s8 + $0xa0] ss:$16 sps:$4 sm:$0xff]  }
 0x211   : > { %2422 = vmatprep.subr.bf16.mxu1 %v4409_v1  ;;  %v4446_v1 = vld [vmem:[%s6047_s8 + $0x84] ss:$16 sps:$4 sm:$0xff]  }
 0x214   : > { %2423 = vmatpush1.bf16.msra.mxu1 %v4407_v3  ;;  %v4444_v3 = vld [vmem:[%s6047_s8 + $0x80] ss:$16 sps:$4 sm:$0xff]  }
 0x215   : > { %2424 = vmatprep.subr.bf16.mxu1 %v4412_v4  ;;  %v4449_v4 = vld [vmem:[%s6047_s8 + $0x64] ss:$16 sps:$4 sm:$0xff]  }
 0x218   : > { %2425 = vmatpush2.bf16.msra.mxu1 %v4410_v5  ;;  %v4447_v5 = vld [vmem:[%s6047_s8 + $0x60] ss:$16 sps:$4 sm:$0xff]  }
 0x219   : > { %2426 = vmatprep.subr.bf16.mxu1 %v4415_v6  ;;  %v4452_v6 = vld [vmem:[%s6047_s8 + $0x44] ss:$16 sps:$4 sm:$0xff]  }
 0x21c   : > { %2427 = vmatpush2.bf16.msra.mxu1 %v4413_v7  ;;  %v4450_v7 = vld [vmem:[%s6047_s8 + $0x40] ss:$16 sps:$4 sm:$0xff]  }
 0x21d   : > { %2428 = vmatprep.subr.bf16.mxu1 %v4418_v8  ;;  %v4455_v8 = vld [vmem:[%s6047_s8 + $0x24] ss:$16 sps:$4 sm:$0xff]  }
 0x220   : > { %2429 = vmatpush2.bf16.msra.mxu1 %v4416_v9  ;;  %v4453_v9 = vld [vmem:[%s6047_s8 + $0x20] ss:$16 sps:$4 sm:$0xff]  }
 0x221   : > { %2430 = vmatprep.subr.bf16.mxu1 %v4421_v10  ;;  %v4458_v10 = vld [vmem:[%s6047_s8 + $0x4] ss:$16 sps:$4 sm:$0xff]  }
 0x224   : > { %2431 = vmatpush2.bf16.msra.mxu1 %v4419_v11  ;;  %v4456_v11 = vld [vmem:[%s6047_s8] ss:$16 sps:$4 sm:$0xff]  }
 0x225   : > { %2432 = vmatprep.subr.bf16.mxu1 %v4424_v12  ;;  %v4461_v12 = vld [vmem:[%s6047_s8 + $0x1e4] ss:$16 sps:$4 sm:$0xff]  }
 0x228   : > { %2433 = vmatpush2.bf16.msra.mxu1 %v4422_v13  ;;  %v4459_v13 = vld [vmem:[%s6047_s8 + $0x1e0] ss:$16 sps:$4 sm:$0xff]  }
 0x229   : > { %2434 = vmatprep.subr.bf16.mxu1 %v4427_v14  ;;  %v4464_v14 = vld [vmem:[%s6047_s8 + $0x1c4] ss:$16 sps:$4 sm:$0xff]  }
 0x22c   : > { %2435 = vmatpush2.bf16.msra.mxu1 %v4425_v15  ;;  %v4462_v15 = vld [vmem:[%s6047_s8 + $0x1c0] ss:$16 sps:$4 sm:$0xff]  }
 0x22d   : > { %2436 = vmatprep.subr.bf16.mxu1 %v4430_v55  ;;  %v4467_v55 = vld [vmem:[%s6047_s8 + $0x1a4] ss:$16 sps:$4 sm:$0xff]  }
 0x230   : > { %2437 = vmatpush2.bf16.msra.mxu1 %v4428_v16 }
 0x231   : > { %2438 = vmatprep.subr.bf16.mxu1 %v4433_v17  ;;  %v4465_v17 = vld [vmem:[%s6047_s8 + $0x1a0] ss:$16 sps:$4 sm:$0xff]  }
 0x234   : > { %2439 = vmatpush2.bf16.msra.mxu1 %v4431_v18  ;;  %v4470_v18 = vld [vmem:[%s6047_s8 + $0x184] ss:$16 sps:$4 sm:$0xff]  }
 0x237   : > { %2441 = vmatmul.mubr.bf16.vlgmr.msra.gmra.mxu1 %v5495_v40 }
 0x238   : > { %2587 = vmatprep.mubr.bf16.mxu1 %v4635_v2 }
 0x277   : > { %v2313_v56 = vpop.f32.mrf.mxu0 }
 0x279   : > { %v2315_v57 = vpop.f32.mrf.mxu0 }
 0x27b   : > { %v2317_v25 = vpop.f32.mrf.mxu0 }
 0x27d   : > { %v2319_v33 = vpop.f32.mrf.mxu0 }
 0x2b7   : > { %v2356_v24 = vpop.f32.mrf.mxu1  ;;  %v2399_v16 = vpop.f32.mrf.mxu0 }
 0x2b8   : > { %v2357_v26 = vadd.f32 %v2356_v24, %v2313_v56  ;;  %v4473_v24 = vld [vmem:[%s6047_s8 + $0x164] ss:$16 sps:$4 sm:$0xff]  }
 0x2b9   : > { %v2358_v27 = vpop.f32.mrf.mxu1  ;;  %v2401_v56 = vpop.f32.mrf.mxu0 }
 0x2ba   : > { %v2359_v29 = vadd.f32 %v2358_v27, %v2315_v57  ;;  %v2451_v40 = vadd.f32 %v2357_v26, %v525_v50  ;;  %v4468_v57 = vld [vmem:[%s6047_s8 + $0x180] ss:$16 sps:$4 sm:$0xff]  }
 0x2bb   : > { %v2360_v30 = vpop.f32.mrf.mxu1  ;;  %v2403_v26 = vpop.f32.mrf.mxu0 }
 0x2bc   : > { %v2452_v31 = vadd.f32 %v2359_v29, %v526_v46  ;;  %v2361_v2 = vadd.f32 %v2360_v30, %v2317_v25  ;;  %v2481_v46 = vadd.f32 %v2464_v41, %v2451_v40  ;;  %v4471_v30 = vld [vmem:[%s6047_s8 + $0x160] ss:$16 sps:$4 sm:$0xff]   ;;  %v2476_v40 = vrot.slane %v5595_v28, %v4938_v20 }
 0x2bd   : > { %v2362_v52 = vpop.f32.mrf.mxu1 }
 0x2be   : > { %v2455_v53 = vadd.f32 %v2361_v2, %v529_v44  ;;  %v2363_v54 = vadd.f32 %v2362_v52, %v2319_v33  ;;  %v2482_v23 = vadd.f32 %v2468_v32, %v2452_v31  ;;  %v2489_v38 = vmax.f32 %v2481_v46, 0.0  ;;  %v4440_v44 = vld [vmem:[%s6047_s8 + $0xc4] ss:$16 sps:$4 sm:$0xff]   ;;  %v2405_v52 = vpop.f32.mrf.mxu0 }
 0x2c0   : > { %v2485_v58 = vadd.f32 %v2464_v41, %v2455_v53  ;;  %v2456_v34 = vadd.f32 %v2363_v54, %v530_v48  ;;  %v2490_v60 = vmax.f32 %v2482_v23, 0.0  ;;  %v4438_v48 = vld [vmem:[%s6047_s8 + $0xc0] ss:$16 sps:$4 sm:$0xff]   ;;  %v2472_v54 = vrot.slane %v5595_v28, %v4942_v22 }
 0x2c2   : > { %v2486_v19 = vadd.f32 %v2468_v32, %v2456_v34  ;;  %v2493_v59 = vmax.f32 %v2485_v58, 0.0  ;;  %v4476_v32 = vld [vmem:[%s6047_s8 + $0x144] ss:$16 sps:$4 sm:$0xff]   ;;  %v4474_v58 = vld [vmem:[%s6047_s8 + $0x140] ss:$16 sps:$4 sm:$0xff]  }
 0x2c4   : > { %v2494_v61 = vmax.f32 %v2486_v19, 0.0  ;;  %v2497_v62 = vpack.c.bf16 %v2493_v59, %v2489_v38  ;;  %v4483_v38 = vld [vmem:[%s6047_s8 + $0x2e0] ss:$16 sps:$4 sm:$0xff]  }
 0x2c6   : > { %v2498_v50 = vpack.c.bf16 %v2494_v61, %v2490_v60 }
 0x2c8   : > { %2526 = vmatprep.subr.bf16.mxu0 %v2498_v50  ;;  %v4485_v50 = vld [vmem:[%s6047_s8 + $0x2e4] ss:$16 sps:$4 sm:$0xff]  }
 0x2c9   : > { %2527 = vmatpush1.bf16.msra.mxu0 %v2497_v62  ;;  %v4489_v62 = vld [vmem:[%s6047_s8 + $0x2c0] ss:$16 sps:$4 sm:$0xff]  }
 0x2ca   : > { %3370 = vmatprep.subr.bf16.mxu0 %v4437_v21  ;;  %v4488_v21 = vld [vmem:[%s6047_s8 + $0xec] ss:$16 sps:$4 sm:$0xff]  }
 0x2cc   : > { %3888 = vmatmul.mubr.msk.bf16.vlgmr.msra.gmra.mxu0 %vm2508_vm1, %v5615_v36 }
 0x2cd   : > { %3371 = vmatpush1.bf16.msra.mxu0 %v4435_v42  ;;  %v4495_v42 = vld [vmem:[%s6047_s8 + $0x2a0] ss:$16 sps:$4 sm:$0xff]  }
 0x2ce   : > { %3372 = vmatprep.subr.bf16.mxu0 %v4440_v44  ;;  %v4497_v44 = vld [vmem:[%s6047_s8 + $0x2a4] ss:$16 sps:$4 sm:$0xff]  }
 0x2d1   : > { %3373 = vmatpush1.bf16.msra.mxu0 %v4438_v48  ;;  %v4501_v48 = vld [vmem:[%s6047_s8 + $0x280] ss:$16 sps:$4 sm:$0xff]  }
 0x2d2   : > { %3374 = vmatprep.subr.bf16.mxu0 %v4443_v63  ;;  %v4503_v63 = vld [vmem:[%s6047_s8 + $0x284] ss:$16 sps:$4 sm:$0xff]  }
 0x2d5   : > { %3375 = vmatpush1.bf16.msra.mxu0 %v4441_v0  ;;  %v4507_v0 = vld [vmem:[%s6047_s8 + $0x260] ss:$16 sps:$4 sm:$0xff]  }
 0x2d6   : > { %3376 = vmatprep.subr.bf16.mxu0 %v4446_v1  ;;  %v4509_v1 = vld [vmem:[%s6047_s8 + $0x264] ss:$16 sps:$4 sm:$0xff]  }
 0x2d9   : > { %3377 = vmatpush1.bf16.msra.mxu0 %v4444_v3  ;;  %v4513_v3 = vld [vmem:[%s6047_s8 + $0x240] ss:$16 sps:$4 sm:$0xff]  }
 0x2da   : > { %3378 = vmatprep.subr.bf16.mxu0 %v4449_v4  ;;  %v4515_v4 = vld [vmem:[%s6047_s8 + $0x244] ss:$16 sps:$4 sm:$0xff]  }
 0x2dd   : > { %3379 = vmatpush1.bf16.msra.mxu0 %v4447_v5  ;;  %v4519_v5 = vld [vmem:[%s6047_s8 + $0x220] ss:$16 sps:$4 sm:$0xff]  }
 0x2de   : > { %3380 = vmatprep.subr.bf16.mxu0 %v4452_v6  ;;  %v4521_v6 = vld [vmem:[%s6047_s8 + $0x224] ss:$16 sps:$4 sm:$0xff]  }
 0x2e1   : > { %3381 = vmatpush1.bf16.msra.mxu0 %v4450_v7  ;;  %v4525_v7 = vld [vmem:[%s6047_s8 + $0x200] ss:$16 sps:$4 sm:$0xff]  }
 0x2e2   : > { %3382 = vmatprep.subr.bf16.mxu0 %v4455_v8  ;;  %v4527_v8 = vld [vmem:[%s6047_s8 + $0x204] ss:$16 sps:$4 sm:$0xff]  }
 0x2e5   : > { %3383 = vmatpush1.bf16.msra.mxu0 %v4453_v9  ;;  %v4531_v9 = vld [vmem:[%s6047_s8 + $0x3e0] ss:$16 sps:$4 sm:$0xff]  }
 0x2e6   : > { %3384 = vmatprep.subr.bf16.mxu0 %v4458_v10  ;;  %v4533_v10 = vld [vmem:[%s6047_s8 + $0x3e4] ss:$16 sps:$4 sm:$0xff]  }
 0x2e9   : > { %3385 = vmatpush1.bf16.msra.mxu0 %v4456_v11  ;;  %v4537_v11 = vld [vmem:[%s6047_s8 + $0x3c0] ss:$16 sps:$4 sm:$0xff]  }
 0x2ea   : > { %3386 = vmatprep.subr.bf16.mxu0 %v4461_v12  ;;  %v4539_v12 = vld [vmem:[%s6047_s8 + $0x3c4] ss:$16 sps:$4 sm:$0xff]  }
 0x2ed   : > { %3387 = vmatpush2.bf16.msra.mxu0 %v4459_v13  ;;  %v4543_v13 = vld [vmem:[%s6047_s8 + $0x3a0] ss:$16 sps:$4 sm:$0xff]  }
 0x2ee   : > { %3388 = vmatprep.subr.bf16.mxu0 %v4464_v14  ;;  %v4545_v14 = vld [vmem:[%s6047_s8 + $0x3a4] ss:$16 sps:$4 sm:$0xff]  }
 0x2f1   : > { %3389 = vmatpush2.bf16.msra.mxu0 %v4462_v15  ;;  %v4549_v15 = vld [vmem:[%s6047_s8 + $0x380] ss:$16 sps:$4 sm:$0xff]  }
 0x2f2   : > { %3390 = vmatprep.subr.bf16.mxu0 %v4467_v55  ;;  %v4551_v55 = vld [vmem:[%s6047_s8 + $0x384] ss:$16 sps:$4 sm:$0xff]  }
 0x2f5   : > { %3391 = vmatpush2.bf16.msra.mxu0 %v4465_v17  ;;  %v4557_v17 = vld [vmem:[%s6047_s8 + $0x364] ss:$16 sps:$4 sm:$0xff]  }
 0x2f6   : > { %3392 = vmatprep.subr.bf16.mxu0 %v4470_v18  ;;  %v4561_v18 = vld [vmem:[%s6047_s8 + $0x340] ss:$16 sps:$4 sm:$0xff]  }
 0x2f7   : > { %v2442_v25 = vpop.f32.mrf.mxu1 }
 0x2f8   : > { %v2443_v27 = vadd.f32 %v2442_v25, %v2399_v16  ;;  %v4555_v16 = vld [vmem:[%s6047_s8 + $0x360] ss:$16 sps:$4 sm:$0xff]   ;;  %v4575_v25 = vld [vmem:[%s6047_s8 + $0x304] ss:$16 sps:$4 sm:$0xff]  }
 0x2f9   : > { %v2444_v29 = vpop.f32.mrf.mxu1  ;;  %3393 = vmatpush2.bf16.msra.mxu0 %v4468_v57  ;;  %v4569_v57 = vld [vmem:[%s6047_s8 + $0x324] ss:$16 sps:$4 sm:$0xff]  }
 0x2fa   : > { %v2445_v31 = vadd.f32 %v2444_v29, %v2401_v56  ;;  %3394 = vmatprep.subr.bf16.mxu0 %v4473_v24  ;;  %v2453_v53 = vadd.f32 %v2443_v27, %v527_v51  ;;  %v4563_v56 = vld [vmem:[%s6047_s8 + $0x344] ss:$16 sps:$4 sm:$0xff]   ;;  %v4567_v24 = vld [vmem:[%s6047_s8 + $0x320] ss:$16 sps:$4 sm:$0xff]   ;;  %v4581_v27 = vld [vmem:[%s6047_s8 + $0x2ec] ss:$16 sps:$4 sm:$0xff]  }
 0x2fb   : > { %v2446_v2 = vpop.f32.mrf.mxu1 }
 0x2fc   : > { %v2454_v33 = vadd.f32 %v2445_v31, %v528_v47  ;;  %v2447_v41 = vadd.f32 %v2446_v2, %v2403_v26  ;;  %v2483_v51 = vadd.f32 %v2472_v54, %v2453_v53  ;;  %v4573_v26 = vld [vmem:[%s6047_s8 + $0x300] ss:$16 sps:$4 sm:$0xff]   ;;  %v4500_v53 = vld [vmem:[%s6047_s8 + $0xac] ss:$16 sps:$4 sm:$0xff]  }
 0x2fd   : > { %v2448_v23 = vpop.f32.mrf.mxu1  ;;  %3395 = vmatpush2.bf16.msra.mxu0 %v4471_v30 }
 0x2fe   : > { %v2457_v35 = vadd.f32 %v2447_v41, %v531_v45  ;;  %v2449_v47 = vadd.f32 %v2448_v23, %v2405_v52  ;;  %3396 = vmatprep.subr.bf16.mxu0 %v4476_v32  ;;  %v2484_v20 = vadd.f32 %v2476_v40, %v2454_v33  ;;  %v2491_v59 = vmax.f32 %v2483_v51, 0.0  ;;  %v4482_v45 = vld [vmem:[%s6047_s8 + $0x104] ss:$16 sps:$4 sm:$0xff]   ;;  %v4494_v41 = vld [vmem:[%s6047_s8 + $0xcc] ss:$16 sps:$4 sm:$0xff]  }
 0x2ff   : > { %v4492_v52 = vld [vmem:[%s6047_s8 + $0xc8] ss:$16 sps:$4 sm:$0xff]   ;;  %v4506_v23 = vld [vmem:[%s6047_s8 + $0x8c] ss:$16 sps:$4 sm:$0xff]  }
 0x300   : > { %v2487_v34 = vadd.f32 %v2472_v54, %v2457_v35  ;;  %v2458_v39 = vadd.f32 %v2449_v47, %v532_v49  ;;  %v2492_v28 = vmax.f32 %v2484_v20, 0.0  ;;  %v4480_v49 = vld [vmem:[%s6047_s8 + $0x100] ss:$16 sps:$4 sm:$0xff]   ;;  %v4498_v54 = vld [vmem:[%s6047_s8 + $0xa8] ss:$16 sps:$4 sm:$0xff]  }
 0x301   : > { %3397 = vmatpush2.bf16.msra.mxu0 %v4474_v58  ;;  %v4504_v58 = vld [vmem:[%s6047_s8 + $0x88] ss:$16 sps:$4 sm:$0xff]   ;;  %v4512_v35 = vld [vmem:[%s6047_s8 + $0x6c] ss:$16 sps:$4 sm:$0xff]  }
 0x302   : > { %v2488_v46 = vadd.f32 %v2476_v40, %v2458_v39  ;;  %v2495_v22 = vmax.f32 %v2487_v34, 0.0  ;;  %3398 = vmatprep.subr.bf16.mxu0 %v4479_v43  ;;  %v4486_v40 = vld [vmem:[%s6047_s8 + $0xe8] ss:$16 sps:$4 sm:$0xff]   ;;  %v4518_v20 = vld [vmem:[%s6047_s8 + $0x4c] ss:$16 sps:$4 sm:$0xff]  }
 0x303   : > { %v4510_v47 = vld [vmem:[%s6047_s8 + $0x68] ss:$16 sps:$4 sm:$0xff]   ;;  %v4524_v39 = vld [vmem:[%s6047_s8 + $0x2c] ss:$16 sps:$4 sm:$0xff]  }
 0x304   : > { %v2496_v19 = vmax.f32 %v2488_v46, 0.0  ;;  %v2499_v61 = vpack.c.bf16 %v2495_v22, %v2491_v59  ;;  %v4516_v34 = vld [vmem:[%s6047_s8 + $0x48] ss:$16 sps:$4 sm:$0xff]   ;;  %v4530_v46 = vld [vmem:[%s6047_s8 + $0xc] ss:$16 sps:$4 sm:$0xff]  }
 0x305   : > { %3399 = vmatpush2.bf16.msra.mxu0 %v4477_v37  ;;  %v4522_v51 = vld [vmem:[%s6047_s8 + $0x28] ss:$16 sps:$4 sm:$0xff]   ;;  %v4542_v59 = vld [vmem:[%s6047_s8 + $0x1cc] ss:$16 sps:$4 sm:$0xff]  }
 0x306   : > { %v2500_v60 = vpack.c.bf16 %v2496_v19, %v2492_v28  ;;  %3400 = vmatprep.subr.bf16.mxu0 %v4482_v45  ;;  %v4528_v22 = vld [vmem:[%s6047_s8 + $0x8] ss:$16 sps:$4 sm:$0xff]   ;;  %v4536_v28 = vld [vmem:[%s6047_s8 + $0x1ec] ss:$16 sps:$4 sm:$0xff]  }
 0x307   : > { %v4534_v19 = vld [vmem:[%s6047_s8 + $0x1e8] ss:$16 sps:$4 sm:$0xff]   ;;  %v4554_v43 = vld [vmem:[%s6047_s8 + $0x18c] ss:$16 sps:$4 sm:$0xff]  }
 0x308   : > { %2569 = vmatprep.subr.bf16.mxu1 %v2500_v60  ;;  %v4540_v60 = vld [vmem:[%s6047_s8 + $0x1c8] ss:$16 sps:$4 sm:$0xff]  }
 0x309   : > { %2570 = vmatpush1.bf16.msra.mxu1 %v2499_v61  ;;  %3401 = vmatpush2.bf16.msra.mxu0 %v4480_v49  ;;  %v4548_v61 = vld [vmem:[%s6047_s8 + $0x1ac] ss:$16 sps:$4 sm:$0xff]   ;;  %v4546_v37 = vld [vmem:[%s6047_s8 + $0x1a8] ss:$16 sps:$4 sm:$0xff]  }
 0x30a   : > { %3413 = vmatprep.subr.bf16.mxu1 %v4485_v50  ;;  %3456 = vmatprep.subr.bf16.mxu0 %v4488_v21  ;;  %v4552_v45 = vld [vmem:[%s6047_s8 + $0x188] ss:$16 sps:$4 sm:$0xff]   ;;  %v4560_v49 = vld [vmem:[%s6047_s8 + $0x16c] ss:$16 sps:$4 sm:$0xff]  }
 0x30b   : > { %v4566_v50 = vld [vmem:[%s6047_s8 + $0x14c] ss:$16 sps:$4 sm:$0xff]   ;;  %v4564_v21 = vld [vmem:[%s6047_s8 + $0x148] ss:$16 sps:$4 sm:$0xff]  }
 0x30c   : > { %3889 = vmatmul.mubr.msk.bf16.vlgmr.msra.gmra.mxu1 %vm2508_vm1, %v5615_v36  ;;  %v4491_v36 = vld [vmem:[%s6047_s8 + $0x2c4] ss:$16 sps:$4 sm:$0xff]  }
 0x30d   : > { %3414 = vmatpush1.bf16.msra.mxu1 %v4483_v38  ;;  %v4558_v38 = vld [vmem:[%s6047_s8 + $0x168] ss:$16 sps:$4 sm:$0xff]  }
 0x30e   : > { %3415 = vmatprep.subr.bf16.mxu1 %v4491_v36  ;;  %v4570_v36 = vld [vmem:[%s6047_s8 + $0x128] ss:$16 sps:$4 sm:$0xff]  }
 0x311   : > { %3416 = vmatpush1.bf16.msra.mxu1 %v4489_v62  ;;  %v4572_v62 = vld [vmem:[%s6047_s8 + $0x12c] ss:$16 sps:$4 sm:$0xff]  }
 0x312   : > { %3417 = vmatprep.subr.bf16.mxu1 %v4497_v44  ;;  %v4578_v44 = vld [vmem:[%s6047_s8 + $0x10c] ss:$16 sps:$4 sm:$0xff]  }
 0x315   : > { %3418 = vmatpush1.bf16.msra.mxu1 %v4495_v42 }
 0x316   : > { %3419 = vmatprep.subr.bf16.mxu1 %v4503_v63  ;;  %v4576_v63 = vld [vmem:[%s6047_s8 + $0x108] ss:$16 sps:$4 sm:$0xff]  }
 0x319   : > { %3420 = vmatpush1.bf16.msra.mxu1 %v4501_v48 }
 0x31a   : > { %3421 = vmatprep.subr.bf16.mxu1 %v4509_v1 }
 0x31d   : > { %3422 = vmatpush1.bf16.msra.mxu1 %v4507_v0 }
 0x31e   : > { %3423 = vmatprep.subr.bf16.mxu1 %v4515_v4  ;;  %v4579_v4 = vld [vmem:[%s6047_s8 + $0x2e8] ss:$16 sps:$4 sm:$0xff]  }
 0x321   : > { %3424 = vmatpush1.bf16.msra.mxu1 %v4513_v3 }
 0x322   : > { %3425 = vmatprep.subr.bf16.mxu1 %v4521_v6  ;;  %v4584_v6 = vld [vmem:[%s6047_s8 + $0x2cc] ss:$16 sps:$4 sm:$0xff]  }
 0x325   : > { %3426 = vmatpush1.bf16.msra.mxu1 %v4519_v5 }
 0x326   : > { %3427 = vmatprep.subr.bf16.mxu1 %v4527_v8  ;;  %v4587_v8 = vld [vmem:[%s6047_s8 + $0x2ac] ss:$16 sps:$4 sm:$0xff]  }
 0x329   : > { %3428 = vmatpush1.bf16.msra.mxu1 %v4525_v7  ;;  %v4582_v7 = vld [vmem:[%s6047_s8 + $0x2c8] ss:$16 sps:$4 sm:$0xff]  }
 0x32a   : > { %3429 = vmatprep.subr.bf16.mxu1 %v4533_v10  ;;  %v4590_v10 = vld [vmem:[%s6047_s8 + $0x28c] ss:$16 sps:$4 sm:$0xff]  }
 0x32d   : > { %3430 = vmatpush2.bf16.msra.mxu1 %v4531_v9  ;;  %v4585_v9 = vld [vmem:[%s6047_s8 + $0x2a8] ss:$16 sps:$4 sm:$0xff]  }
 0x32e   : > { %3431 = vmatprep.subr.bf16.mxu1 %v4539_v12  ;;  %v4593_v12 = vld [vmem:[%s6047_s8 + $0x26c] ss:$16 sps:$4 sm:$0xff]  }
 0x331   : > { %3432 = vmatpush2.bf16.msra.mxu1 %v4537_v11  ;;  %v4588_v11 = vld [vmem:[%s6047_s8 + $0x288] ss:$16 sps:$4 sm:$0xff]  }
 0x332   : > { %3433 = vmatprep.subr.bf16.mxu1 %v4545_v14  ;;  %v4596_v14 = vld [vmem:[%s6047_s8 + $0x24c] ss:$16 sps:$4 sm:$0xff]  }
 0x335   : > { %3434 = vmatpush2.bf16.msra.mxu1 %v4543_v13  ;;  %v4591_v13 = vld [vmem:[%s6047_s8 + $0x268] ss:$16 sps:$4 sm:$0xff]  }
 0x336   : > { %3435 = vmatprep.subr.bf16.mxu1 %v4551_v55  ;;  %v4599_v55 = vld [vmem:[%s6047_s8 + $0x22c] ss:$16 sps:$4 sm:$0xff]  }
 0x339   : > { %3436 = vmatpush2.bf16.msra.mxu1 %v4549_v15  ;;  %v4594_v15 = vld [vmem:[%s6047_s8 + $0x248] ss:$16 sps:$4 sm:$0xff]  }
 0x33a   : > { %3437 = vmatprep.subr.bf16.mxu1 %v4557_v17  ;;  %v4602_v17 = vld [vmem:[%s6047_s8 + $0x20c] ss:$16 sps:$4 sm:$0xff]  }
 0x33d   : > { %3438 = vmatpush2.bf16.msra.mxu1 %v4555_v16  ;;  %v4597_v16 = vld [vmem:[%s6047_s8 + $0x228] ss:$16 sps:$4 sm:$0xff]  }
 0x33e   : > { %3439 = vmatprep.subr.bf16.mxu1 %v4563_v56  ;;  %v4605_v56 = vld [vmem:[%s6047_s8 + $0x3ec] ss:$16 sps:$4 sm:$0xff]  }
 0x341   : > { %3440 = vmatpush2.bf16.msra.mxu1 %v4561_v18  ;;  %v4600_v18 = vld [vmem:[%s6047_s8 + $0x208] ss:$16 sps:$4 sm:$0xff]  }
 0x342   : > { %3441 = vmatprep.subr.bf16.mxu1 %v4569_v57  ;;  %v4603_v57 = vld [vmem:[%s6047_s8 + $0x3e8] ss:$16 sps:$4 sm:$0xff]  }
 0x345   : > { %3442 = vmatpush2.bf16.msra.mxu1 %v4567_v24  ;;  %v4608_v24 = vld [vmem:[%s6047_s8 + $0x3cc] ss:$16 sps:$4 sm:$0xff]  }
 0x346   : > { %3443 = vmatprep.subr.bf16.mxu1 %v4575_v25  ;;  %v4606_v25 = vld [vmem:[%s6047_s8 + $0x3c8] ss:$16 sps:$4 sm:$0xff]  }
 0x349   : > { %3444 = vmatpush2.bf16.msra.mxu1 %v4573_v26  ;;  %v4611_v26 = vld [vmem:[%s6047_s8 + $0x3ac] ss:$16 sps:$4 sm:$0xff]  }
 0x34a   : > { %3499 = vmatprep.subr.bf16.mxu1 %v4581_v27  ;;  %v4609_v27 = vld [vmem:[%s6047_s8 + $0x3a8] ss:$16 sps:$4 sm:$0xff]  }
 0x38c   : > { %v2546_v29 = vpop.f32.mrf.mxu0 }
 0x38e   : > { %v2548_v30 = vpop.f32.mrf.mxu0 }
 0x390   : > { %v2550_v31 = vpop.f32.mrf.mxu0 }
 0x391   : > { %v5828_v32 = vpack.c.bf16 %v2550_v31, %v2546_v29  ;;  %v4614_v29 = vld [vmem:[%s6047_s8 + $0x38c] ss:$16 sps:$4 sm:$0xff]  }
 0x392   : > { %v2552_v2 = vpop.f32.mrf.mxu0  ;;  %v4617_v31 = vld [vmem:[%s6047_s8 + $0x36c] ss:$16 sps:$4 sm:$0xff]  }
 0x393   : > { %v2599_v33 = vpack.c.bf16 %v2552_v2, %v2548_v30  ;;  %v4612_v30 = vld [vmem:[%s6047_s8 + $0x388] ss:$16 sps:$4 sm:$0xff]   ;;  %v4620_v2 = vld [vmem:[%s6047_s8 + $0x34c] ss:$16 sps:$4 sm:$0xff]  }
 0x395   : > { %3402 = vmatprep.mubr.bf16.mxu0 %v2599_v33 }
 0x396   : > { %3403 = vmatmul.mubr.bf16.vlgmr.msra.gmra.mxu0 %v5828_v32 }
 0x397   : > { %3457 = vmatpush1.bf16.msra.mxu0 %v4486_v40  ;;  %3488 = vmatprep.mubr.bf16.mxu0 %v2599_v33  ;;  %v4618_v33 = vld [vmem:[%s6047_s8 + $0x348] ss:$16 sps:$4 sm:$0xff]   ;;  %v4623_v40 = vld [vmem:[%s6047_s8 + $0x32c] ss:$16 sps:$4 sm:$0xff]  }
 0x398   : > { %3458 = vmatprep.subr.bf16.mxu0 %v4494_v41  ;;  %v4621_v41 = vld [vmem:[%s6047_s8 + $0x328] ss:$16 sps:$4 sm:$0xff]  }
 0x39b   : > { %3459 = vmatpush1.bf16.msra.mxu0 %v4492_v52  ;;  %v4626_v52 = vld [vmem:[%s6047_s8 + $0x30c] ss:$16 sps:$4 sm:$0xff]  }
 0x39c   : > { %3460 = vmatprep.subr.bf16.mxu0 %v4500_v53  ;;  %v4624_v53 = vld [vmem:[%s6047_s8 + $0x308] ss:$16 sps:$4 sm:$0xff]  }
 0x39f   : > { %3461 = vmatpush1.bf16.msra.mxu0 %v4498_v54 }
 0x3a0   : > { %3462 = vmatprep.subr.bf16.mxu0 %v4506_v23 }
 0x3a3   : > { %3463 = vmatpush1.bf16.msra.mxu0 %v4504_v58 }
 0x3a4   : > { %3464 = vmatprep.subr.bf16.mxu0 %v4512_v35 }
 0x3a7   : > { %3465 = vmatpush1.bf16.msra.mxu0 %v4510_v47 }
 0x3a8   : > { %3466 = vmatprep.subr.bf16.mxu0 %v4518_v20 }
 0x3ab   : > { %3467 = vmatpush1.bf16.msra.mxu0 %v4516_v34 }
 0x3ac   : > { %3468 = vmatprep.subr.bf16.mxu0 %v4524_v39 }
 0x3af   : > { %3469 = vmatpush1.bf16.msra.mxu0 %v4522_v51 }
 0x3b0   : > { %3470 = vmatprep.subr.bf16.mxu0 %v4530_v46 }
 0x3b3   : > { %3471 = vmatpush1.bf16.msra.mxu0 %v4528_v22 }
 0x3b4   : > { %3472 = vmatprep.subr.bf16.mxu0 %v4536_v28 }
 0x3b7   : > { %3473 = vmatpush2.bf16.msra.mxu0 %v4534_v19 }
 0x3b8   : > { %3474 = vmatprep.subr.bf16.mxu0 %v4542_v59 }
 0x3bb   : > { %3475 = vmatpush2.bf16.msra.mxu0 %v4540_v60 }
 0x3bc   : > { %3476 = vmatprep.subr.bf16.mxu0 %v4548_v61 }
 0x3bf   : > { %3477 = vmatpush2.bf16.msra.mxu0 %v4546_v37 }
 0x3c0   : > { %3478 = vmatprep.subr.bf16.mxu0 %v4554_v43 }
 0x3c3   : > { %3479 = vmatpush2.bf16.msra.mxu0 %v4552_v45 }
 0x3c4   : > { %3480 = vmatprep.subr.bf16.mxu0 %v4560_v49 }
 0x3c7   : > { %3481 = vmatpush2.bf16.msra.mxu0 %v4558_v38 }
 0x3c8   : > { %3482 = vmatprep.subr.bf16.mxu0 %v4566_v50 }
 0x3cb   : > { %3483 = vmatpush2.bf16.msra.mxu0 %v4564_v21 }
 0x3cc   : > { %v2589_v42 = vpop.f32.mrf.mxu1  ;;  %3484 = vmatprep.subr.bf16.mxu0 %v4572_v62 }
 0x3ce   : > { %v2591_v48 = vpop.f32.mrf.mxu1 }
 0x3cf   : > { %3485 = vmatpush2.bf16.msra.mxu0 %v4570_v36 }
 0x3d0   : > { %v2593_v0 = vpop.f32.mrf.mxu1  ;;  %3486 = vmatprep.subr.bf16.mxu0 %v4578_v44 }
 0x3d1   : > { %v5927_v5 = vpack.c.bf16 %v2593_v0, %v2589_v42 }
 0x3d2   : > { %v2595_v1 = vpop.f32.mrf.mxu1 }
 0x3d3   : > { %v2601_v3 = vpack.c.bf16 %v2595_v1, %v2591_v48  ;;  %3487 = vmatpush2.bf16.msra.mxu0 %v4576_v63 }
 0x3d5   : > { %3445 = vmatprep.mubr.bf16.mxu1 %v2601_v3 }
 0x3d6   : > { %3446 = vmatmul.mubr.bf16.vlgmr.msra.gmra.mxu1 %v5927_v5  ;;  %3489 = vmatmul.mubr.bf16.vlgmr.msra.gmra.mxu0 %v5828_v32  ;;  %v4615_v32 = vld [vmem:[%s6047_s8 + $0x368] ss:$16 sps:$4 sm:$0xff]  }
 0x3d7   : > { %3500 = vmatpush1.bf16.msra.mxu1 %v4579_v4  ;;  %3531 = vmatprep.mubr.bf16.mxu1 %v2601_v3 }
 0x3d8   : > { %3501 = vmatprep.subr.bf16.mxu1 %v4584_v6 }
 0x3db   : > { %3502 = vmatpush1.bf16.msra.mxu1 %v4582_v7 }
 0x3dc   : > { %3503 = vmatprep.subr.bf16.mxu1 %v4587_v8 }
 0x3df   : > { %3504 = vmatpush1.bf16.msra.mxu1 %v4585_v9 }
 0x3e0   : > { %3505 = vmatprep.subr.bf16.mxu1 %v4590_v10 }
 0x3e3   : > { %3506 = vmatpush1.bf16.msra.mxu1 %v4588_v11 }
 0x3e4   : > { %3507 = vmatprep.subr.bf16.mxu1 %v4593_v12 }
 0x3e7   : > { %3508 = vmatpush1.bf16.msra.mxu1 %v4591_v13 }
 0x3e8   : > { %3509 = vmatprep.subr.bf16.mxu1 %v4596_v14 }
 0x3eb   : > { %3510 = vmatpush1.bf16.msra.mxu1 %v4594_v15 }
 0x3ec   : > { %3511 = vmatprep.subr.bf16.mxu1 %v4599_v55 }
 0x3ef   : > { %3512 = vmatpush1.bf16.msra.mxu1 %v4597_v16 }
 0x3f0   : > { %3513 = vmatprep.subr.bf16.mxu1 %v4602_v17 }
 0x3f3   : > { %3514 = vmatpush1.bf16.msra.mxu1 %v4600_v18 }
 0x3f4   : > { %3515 = vmatprep.subr.bf16.mxu1 %v4605_v56 }
 0x3f7   : > { %3516 = vmatpush2.bf16.msra.mxu1 %v4603_v57 }
 0x3f8   : > { %3517 = vmatprep.subr.bf16.mxu1 %v4608_v24 }
 0x3fb   : > { %3518 = vmatpush2.bf16.msra.mxu1 %v4606_v25 }
 0x3fc   : > { %3519 = vmatprep.subr.bf16.mxu1 %v4611_v26 }
 0x3ff   : > { %3520 = vmatpush2.bf16.msra.mxu1 %v4609_v27 }
 0x400   : > { %3521 = vmatprep.subr.bf16.mxu1 %v4614_v29 }
 0x403   : > { %3522 = vmatpush2.bf16.msra.mxu1 %v4612_v30 }
 0x404   : > { %3523 = vmatprep.subr.bf16.mxu1 %v4617_v31 }
 0x407   : > { %3524 = vmatpush2.bf16.msra.mxu1 %v4615_v32 }
 0x408   : > { %3525 = vmatprep.subr.bf16.mxu1 %v4620_v2 }
 0x40b   : > { %3526 = vmatpush2.bf16.msra.mxu1 %v4618_v33 }
 0x40c   : > { %3527 = vmatprep.subr.bf16.mxu1 %v4623_v40 }
 0x40f   : > { %3528 = vmatpush2.bf16.msra.mxu1 %v4621_v41 }
 0x410   : > { %3529 = vmatprep.subr.bf16.mxu1 %v4626_v52 }
 0x413   : > { %3530 = vmatpush2.bf16.msra.mxu1 %v4624_v53 }
 0x416   : > { %3532 = vmatmul.mubr.bf16.vlgmr.msra.gmra.mxu1 %v5927_v5 }
 0x456   : > { %v3404_v54 = vpop.f32.mrf.mxu0 }
 0x458   : > { %v3406_v23 = vpop.f32.mrf.mxu0 }
 0x45a   : > { %v3408_v47 = vpop.f32.mrf.mxu0 }
 0x45c   : > { %v3410_v46 = vpop.f32.mrf.mxu0 }
 0x496   : > { %v3447_v58 = vpop.f32.mrf.mxu1  ;;  %v3490_v19 = vpop.f32.mrf.mxu0 }
 0x497   : > { %v3448_v35 = vadd.f32 %v3447_v58, %v3404_v54 }
 0x498   : > { %v3449_v20 = vpop.f32.mrf.mxu1  ;;  %v3492_v59 = vpop.f32.mrf.mxu0 }
 0x499   : > { %3542 = vst [vmem:[%s6026_s20] sm:$0xff] %v3448_v35  ;;  %v3450_v34 = vadd.f32 %v3449_v20, %v3406_v23 }
 0x49a   : > { %v3451_v39 = vpop.f32.mrf.mxu1  ;;  %v3494_v37 = vpop.f32.mrf.mxu0 }
 0x49b   : > { %3543 = vst [vmem:[%s6026_s20 + $0x8] sm:$0xff] %v3450_v34  ;;  %v3452_v51 = vadd.f32 %v3451_v39, %v3408_v47 }
 0x49c   : > { %v3453_v22 = vpop.f32.mrf.mxu1  ;;  %v3496_v50 = vpop.f32.mrf.mxu0 }
 0x49d   : > { %3547 = vst [vmem:[%s6026_s20 + $0x20] sm:$0x3f] %v3452_v51  ;;  %v3454_v28 = vadd.f32 %v3453_v22, %v3410_v46 }
 0x49f   : > { %3548 = vst [vmem:[%s6026_s20 + $0x28] sm:$0x3f] %v3454_v28 }
 0x4d6   : > { %v3533_v60 = vpop.f32.mrf.mxu1 }
 0x4d7   : > { %v3534_v61 = vadd.f32 %v3533_v60, %v3490_v19 }
 0x4d8   : > { %v3535_v43 = vpop.f32.mrf.mxu1 }
 0x4d9   : > { %3544 = vst [vmem:[%s6026_s20 + $0x10] sm:$0xff] %v3534_v61  ;;  %v3536_v45 = vadd.f32 %v3535_v43, %v3492_v59 }
 0x4da   : > { %v3537_v49 = vpop.f32.mrf.mxu1 }
 0x4db   : > { %3546 = vst.msk [vmem:[%s6026_s20 + $0x18] sm:$0xff] %vm3545_vm2, %v3536_v45  ;;  %v3538_v38 = vadd.f32 %v3537_v49, %v3494_v37 }
 0x4dc   : > { %v3539_v21 = vpop.f32.mrf.mxu1 }
 0x4dd   : > { %3549 = vst [vmem:[%s6026_s20 + $0x30] sm:$0x3f] %v3538_v38  ;;  %v3540_v62 = vadd.f32 %v3539_v21, %v3496_v50 }
 0x4df   : > { %3551 = vst.msk [vmem:[%s6026_s20 + $0x38] sm:$0x3f] %vm3550_vm3, %v3540_v62 }
 0x4e0 PF: > { %s19_s30 = sadd.s32 1, %s4633_s30  }
 0x4e1   : > { %p16_p4 = scmp.ge.s32.totalorder %s19_s30, 4  }
 0x4e3   :  { %18 = sbr.rel (!%p16_p4) target bundleno = 1 (0x1), region = 86 }

</bundles_post_ra>
